<compile_context>
chip_gen: v7x
topology: tpu7x:2x2x1
jax: 0.10.0
libtpu: 0.0.40
codegen_flags: <defaults>
</compile_context>

<pallas_src>
import functools

import jax
import jax.numpy as jnp
from jax.experimental import pallas as pl
from jax.experimental.pallas import tpu as pltpu


def _round_up(x, m):
    return (x + m - 1) // m * m


def _vmem_limit_bytes():
    cap = 64 * 1024 * 1024  # conservative fallback (v7x per-TC physical VMEM)
    try:
        cap = int(getattr(pltpu.get_tpu_info(), "vmem_capacity_bytes", cap))
    except Exception:
        pass
    # 5/8 of physical: 80 MiB on 128 MiB parts (v5e/v6e), 40 MiB on v7x.
    return min(cap * 5 // 8, 96 * 1024 * 1024)


def _pick_block_h(H, W, target_rows):
    """Largest divisor th of H with th*W <= target_rows and (th*W) % 8 == 0."""
    best = None
    for th in range(1, H + 1):
        if H % th:
            continue
        if (th * W) % 8 != 0 and th != H:
            continue
        if th * W <= target_rows:
            best = th
    return best if best is not None else H  # whole image (full-dim block)


def _build_conv_lhs(x_ref, r0, th, wo):
    """Fused-K conv operand: (th*wo, 9*C_in) bf16 from 9 shifted views of x_ref."""
    c_in = x_ref.shape[-1]
    taps = []
    for dh in range(3):
        rows = x_ref[pl.ds(r0 + dh, th), :, :]           # (th, W+2, C_in)
        for dw in range(3):
            taps.append(rows[:, dw:dw + wo, :])           # (th, W, C_in)
    return jnp.concatenate(taps, axis=-1).reshape(th * wo, 9 * c_in)


def _conv_stats_kernel(x_ref, w_ref, stats_ref, *, th, wo):
    # x_ref:     (H+2, W+2, C_in) padded bf16 image of this batch element (resident
    #                             across the t grid axis).
    # w_ref:     (9*C_in, Cp)     fused-tap weights (bf16).
    # stats_ref: (2, Cp)          per-(n, t) partial [sum, sumsq] (f32).
    t = pl.program_id(1)
    r0 = pl.multiple_of(t * th, th)
    lhs = _build_conv_lhs(x_ref, r0, th, wo)
    acc = jnp.dot(lhs, w_ref[...], preferred_element_type=jnp.float32)  # (th*W, Cp)
    s = jnp.sum(acc, axis=0, keepdims=True)                             # (1, Cp)
    sq = jnp.sum(acc * acc, axis=0, keepdims=True)                      # (1, Cp)
    stats_ref[...] = jnp.concatenate([s, sq], axis=0)                   # (2, Cp)


def _conv_bn_relu_kernel(x_ref, w_ref, scale_ref, shift_ref, o_ref, *, th, wo):
    # Recompute the conv tile and apply the folded BN (scale/shift) + ReLU directly.
    t = pl.program_id(1)
    r0 = pl.multiple_of(t * th, th)
    lhs = _build_conv_lhs(x_ref, r0, th, wo)
    acc = jnp.dot(lhs, w_ref[...], preferred_element_type=jnp.float32)  # (th*W, Cp)
    o_ref[...] = jnp.maximum(acc * scale_ref[...] + shift_ref[...], 0.0)


def _conv_bn_relu_impl(x_nchw, weight, gamma, beta, eps=1e-5, block_h=None):
    """x_nchw: (N, C_in, H, W); weight: (C_out, C_in, 3, 3); gamma/beta: (C_out,)."""
    N, C_in, H, W = x_nchw.shape
    C_out, _, kh, kw = weight.shape
    assert (kh, kw) == (3, 3)

    # Lane-dense output channels; 256-multiple for >128 channels (v6e/v7x 256-wide MXU).
    Cp = _round_up(C_out, 256) if C_out > 128 else _round_up(C_out, 128)
    K9 = 9 * C_in

    vmem_limit = _vmem_limit_bytes()
    # Per-output-row VMEM working set (bytes): f32 acc + double-buffered f32 out block
    # + bf16 fused-K operand (lane-padded to >=128).
    per_row = 3 * Cp * 4 + max(_round_up(K9, 128), 128) * 2
    target_rows = max(256, min(2048, (vmem_limit // 4) // per_row))
    th = block_h if block_h is not None else _pick_block_h(H, W, target_rows)
    assert H % th == 0
    T = H // th
    M_tile = th * W

    # Resident padded-image block (double-buffered across n).
    x_block_bytes = 2 * (H + 2) * _round_up(W + 2, 16) * _round_up(C_in, 128) * 2
    assert x_block_bytes < vmem_limit // 2, (
        "padded-image VMEM block too large; switch to halo-tiled row blocks "
        "(TODO(synk): manual make_async_copy halo tiling)")

    # --- layout glue (fused by the surrounding jit): NCHW -> NHWC, pad=1, bf16 ---
    x_nhwc = jnp.transpose(x_nchw, (0, 2, 3, 1)).astype(jnp.bfloat16)
    xp = jnp.pad(x_nhwc, ((0, 0), (1, 1), (1, 1), (0, 0)))

    # fused-tap weights: (C_out, C_in, 3, 3) -> (9*C_in, Cp), zero-padded out channels.
    # Row index = (dh*3 + dw)*C_in + c, matching _build_conv_lhs's concatenation order.
    w_flat = jnp.transpose(weight, (2, 3, 1, 0)).reshape(K9, C_out)
    w_flat = jnp.pad(w_flat, ((0, 0), (0, Cp - C_out))).astype(jnp.bfloat16)

    cparams = pltpu.CompilerParams(
        dimension_semantics=("parallel", "parallel"),
        vmem_limit_bytes=vmem_limit,
    )

    # ---- phase 1: conv -> per-(n, t) partial [sum, sumsq] ----
    stats = pl.pallas_call(
        functools.partial(_conv_stats_kernel, th=th, wo=W),
        grid=(N, T),
        in_specs=[
            pl.BlockSpec((None, H + 2, W + 2, C_in), lambda n, t: (n, 0, 0, 0)),
            pl.BlockSpec((K9, Cp), lambda n, t: (0, 0)),
        ],
        out_specs=pl.BlockSpec((None, None, 2, Cp), lambda n, t: (n, t, 0, 0)),
        out_shape=jax.ShapeDtypeStruct((N, T, 2, Cp), jnp.float32),
        compiler_params=cparams,
    )(xp, w_flat)

    # ---- tiny (C,)-sized math: fold BN (batch stats, biased var) into scale/shift ----
    cnt = jnp.float32(N * H * W)
    total = jnp.sum(stats, axis=(0, 1))                      # (2, Cp)
    mean = total[0] / cnt
    var = jnp.maximum(total[1] / cnt - mean * mean, 0.0)
    gamma_p = jnp.pad(gamma.astype(jnp.float32), (0, Cp - C_out))
    beta_p = jnp.pad(beta.astype(jnp.float32), (0, Cp - C_out))
    scale = (gamma_p * jax.lax.rsqrt(var + eps)).reshape(1, Cp)
    shift = (beta_p - mean * scale[0]).reshape(1, Cp)

    # ---- phase 2: recompute conv, apply scale/shift + ReLU, write final output ----
    out_flat = pl.pallas_call(
        functools.partial(_conv_bn_relu_kernel, th=th, wo=W),
        grid=(N, T),
        in_specs=[
            pl.BlockSpec((None, H + 2, W + 2, C_in), lambda n, t: (n, 0, 0, 0)),
            pl.BlockSpec((K9, Cp), lambda n, t: (0, 0)),
            pl.BlockSpec((1, Cp), lambda n, t: (0, 0)),
            pl.BlockSpec((1, Cp), lambda n, t: (0, 0)),
        ],
        out_specs=pl.BlockSpec((None, M_tile, Cp), lambda n, t: (n, t, 0)),
        out_shape=jax.ShapeDtypeStruct((N, H * W, Cp), jnp.float32),
        compiler_params=cparams,
    )(xp, w_flat, scale, shift)

    # TODO(synk): lane-dense (th, W*C_out) repack in-kernel would avoid this padded
    # write + slice when C_out << 128.
    out = out_flat[:, :, :C_out].reshape(N, H, W, C_out)
    return jnp.transpose(out, (0, 3, 1, 2))


conv_bn_relu = jax.jit(_conv_bn_relu_impl, static_argnames=("eps", "block_h"))


def _reference(x_nchw, weight, gamma, beta, eps=1e-5):
    y = jax.lax.conv_general_dilated(
        x_nchw.astype(jnp.float32), weight.astype(jnp.float32),
        window_strides=(1, 1), padding=((1, 1), (1, 1)),
        dimension_numbers=("NCHW", "OIHW", "NCHW"))
    mean = jnp.mean(y, axis=(0, 2, 3), keepdims=True)
    var = jnp.mean((y - mean) ** 2, axis=(0, 2, 3), keepdims=True)
    yn = (y - mean) / jnp.sqrt(var + eps)
    yn = yn * gamma.reshape(1, -1, 1, 1) + beta.reshape(1, -1, 1, 1)
    return jnp.maximum(yn, 0.0)


if __name__ == "__main__":
    key = jax.random.PRNGKey(0)
    k_x, k_w, k_g, k_b = jax.random.split(key, 4)

    N, C_in, H, W = 2, 4, 16, 16
    C_out, K = 8, 3

    x = jax.random.normal(k_x, (N, C_in, H, W), dtype=jnp.float32)
    fan_in = C_in * K * K
    weight = jax.random.normal(k_w, (C_out, C_in, K, K), dtype=jnp.float32) * (2.0 / fan_in) ** 0.5
    gamma = 1.0 + 0.1 * jax.random.normal(k_g, (C_out,), dtype=jnp.float32)
    beta = 0.1 * jax.random.normal(k_b, (C_out,), dtype=jnp.float32)

    # block_h=8 -> 2 H-tiles per image, exercising the per-tile partial-stats path.
    out = conv_bn_relu(x, weight, gamma, beta, block_h=8)
    out = jax.block_until_ready(out)

    ref = _reference(x, weight, gamma, beta)
    assert out.shape == (N, C_out, H, W)
    # bf16 MXU inputs with f32 accumulation -> relaxed tolerance vs f32 reference
    assert jnp.max(jnp.abs(out - ref)) < 5e-2

    print("KERNEL_OK")
</pallas_src>

<mosaic_0001>
module attributes {stable_mosaic.version = 11 : i64} {
  func.func @_conv_stats_kernel(%arg0: i32, %arg1: i32, %arg2: memref<1x18x18x4xbf16, #tpu.memory_space<vmem>>, %arg3: memref<36x128xbf16, #tpu.memory_space<vmem>>, %arg4: memref<1x1x2x128xf32, #tpu.memory_space<vmem>>) attributes {dimension_semantics = [#tpu.dimension_semantics<parallel>, #tpu.dimension_semantics<parallel>], iteration_bounds = array<i64: 2, 2>, scalar_prefetch = 0 : i64, scratch_operands = 0 : i64, tpu.core_type = #tpu.core_type<tc>, window_params = [{transform_indices = @transform_0, window_bounds = array<i64: 1, 18, 18, 4>}, {pipeline_mode = #tpu.pipeline_mode<synchronous>, transform_indices = @transform_1, window_bounds = array<i64: 36, 128>}, {transform_indices = @transform_2, window_bounds = array<i64: 1, 1, 2, 128>}]} {
    %c8_i32 = arith.constant 8 : i32
    %0 = arith.muli %arg1, %c8_i32 : i32
    %1 = tpu.assume_multiple %0, 8 : i32
    %c0_i32 = arith.constant 0 : i32
    %2 = arith.addi %1, %c0_i32 : i32
    %c0 = arith.constant 0 : index
    %3 = arith.index_cast %2 : i32 to index
    %c0_0 = arith.constant 0 : index
    %c0_1 = arith.constant 0 : index
    %4 = vector.load %arg2[%c0, %3, %c0_0, %c0_1] : memref<1x18x18x4xbf16, #tpu.memory_space<vmem>>, vector<1x8x18x4xbf16>
    %5 = vector.shape_cast %4 : vector<1x8x18x4xbf16> to vector<8x18x4xbf16>
    %6 = vector.extract_strided_slice %5 {offsets = [0, 0, 0], sizes = [8, 16, 4], strides = [1, 1, 1]} : vector<8x18x4xbf16> to vector<8x16x4xbf16>
    %7 = vector.extract_strided_slice %5 {offsets = [0, 1, 0], sizes = [8, 16, 4], strides = [1, 1, 1]} : vector<8x18x4xbf16> to vector<8x16x4xbf16>
    %8 = vector.extract_strided_slice %5 {offsets = [0, 2, 0], sizes = [8, 16, 4], strides = [1, 1, 1]} : vector<8x18x4xbf16> to vector<8x16x4xbf16>
    %c1_i32 = arith.constant 1 : i32
    %9 = arith.addi %1, %c1_i32 : i32
    %c0_2 = arith.constant 0 : index
    %10 = arith.index_cast %9 : i32 to index
    %c0_3 = arith.constant 0 : index
    %c0_4 = arith.constant 0 : index
    %11 = vector.load %arg2[%c0_2, %10, %c0_3, %c0_4] : memref<1x18x18x4xbf16, #tpu.memory_space<vmem>>, vector<1x8x18x4xbf16>
    %12 = vector.shape_cast %11 : vector<1x8x18x4xbf16> to vector<8x18x4xbf16>
    %13 = vector.extract_strided_slice %12 {offsets = [0, 0, 0], sizes = [8, 16, 4], strides = [1, 1, 1]} : vector<8x18x4xbf16> to vector<8x16x4xbf16>
    %14 = vector.extract_strided_slice %12 {offsets = [0, 1, 0], sizes = [8, 16, 4], strides = [1, 1, 1]} : vector<8x18x4xbf16> to vector<8x16x4xbf16>
    %15 = vector.extract_strided_slice %12 {offsets = [0, 2, 0], sizes = [8, 16, 4], strides = [1, 1, 1]} : vector<8x18x4xbf16> to vector<8x16x4xbf16>
    %c2_i32 = arith.constant 2 : i32
    %16 = arith.addi %1, %c2_i32 : i32
    %c0_5 = arith.constant 0 : index
    %17 = arith.index_cast %16 : i32 to index
    %c0_6 = arith.constant 0 : index
    %c0_7 = arith.constant 0 : index
    %18 = vector.load %arg2[%c0_5, %17, %c0_6, %c0_7] : memref<1x18x18x4xbf16, #tpu.memory_space<vmem>>, vector<1x8x18x4xbf16>
    %19 = vector.shape_cast %18 : vector<1x8x18x4xbf16> to vector<8x18x4xbf16>
    %20 = vector.extract_strided_slice %19 {offsets = [0, 0, 0], sizes = [8, 16, 4], strides = [1, 1, 1]} : vector<8x18x4xbf16> to vector<8x16x4xbf16>
    %21 = vector.extract_strided_slice %19 {offsets = [0, 1, 0], sizes = [8, 16, 4], strides = [1, 1, 1]} : vector<8x18x4xbf16> to vector<8x16x4xbf16>
    %22 = vector.extract_strided_slice %19 {offsets = [0, 2, 0], sizes = [8, 16, 4], strides = [1, 1, 1]} : vector<8x18x4xbf16> to vector<8x16x4xbf16>
    %23 = tpu.concatenate %6, %7, %8, %13, %14, %15, %20, %21, %22 in 2 : vector<8x16x4xbf16>, vector<8x16x4xbf16>, vector<8x16x4xbf16>, vector<8x16x4xbf16>, vector<8x16x4xbf16>, vector<8x16x4xbf16>, vector<8x16x4xbf16>, vector<8x16x4xbf16>, vector<8x16x4xbf16> -> vector<8x16x36xbf16>
    %24 = vector.shape_cast %23 : vector<8x16x36xbf16> to vector<128x36xbf16>
    %c0_8 = arith.constant 0 : index
    %c0_9 = arith.constant 0 : index
    %25 = vector.load %arg3[%c0_8, %c0_9] : memref<36x128xbf16, #tpu.memory_space<vmem>>, vector<36x128xbf16>
    %cst = arith.constant dense<0.000000e+00> : vector<128x128xf32>
    %26 = tpu.matmul %24, %25, %cst {dimension_numbers = #tpu.dot_dimension_numbers<[1], [0], [0], [1], [0, 0, 1, 1], [], []>} : vector<128x36xbf16>, vector<36x128xbf16>, vector<128x128xf32> -> vector<128x128xf32>
    %cst_10 = arith.constant dense<0.000000e+00> : vector<128xf32>
    %27 = vector.multi_reduction <add>, %26, %cst_10 [0] : vector<128x128xf32> to vector<128xf32>
    %28 = vector.shape_cast %27 : vector<128xf32> to vector<1x128xf32>
    %29 = arith.mulf %26, %26 : vector<128x128xf32>
    %cst_11 = arith.constant dense<0.000000e+00> : vector<128xf32>
    %30 = vector.multi_reduction <add>, %29, %cst_11 [0] : vector<128x128xf32> to vector<128xf32>
    %31 = vector.shape_cast %30 : vector<128xf32> to vector<1x128xf32>
    %32 = tpu.concatenate %28, %31 in 0 : vector<1x128xf32>, vector<1x128xf32> -> vector<2x128xf32>
    %c0_12 = arith.constant 0 : index
    %c0_13 = arith.constant 0 : index
    %c0_14 = arith.constant 0 : index
    %c0_15 = arith.constant 0 : index
    %33 = vector.load %arg4[%c0_12, %c0_13, %c0_14, %c0_15] : memref<1x1x2x128xf32, #tpu.memory_space<vmem>>, vector<1x1x2x128xf32>
    %34 = vector.shape_cast %33 : vector<1x1x2x128xf32> to vector<2x128xf32>
    %35 = vector.shape_cast %32 : vector<2x128xf32> to vector<1x1x2x128xf32>
    tpu.vector_store %arg4[%c0_12, %c0_13, %c0_14, %c0_15], %35 {strides = array<i32>} : memref<1x1x2x128xf32, #tpu.memory_space<vmem>>, vector<1x1x2x128xf32>,
    return
  }
  func.func @transform_0(%arg0: i32, %arg1: i32) -> (i32, i32, i32, i32) {
    %c0_i32 = arith.constant 0 : i32
    %c0_i32_0 = arith.constant 0 : i32
    %c0_i32_1 = arith.constant 0 : i32
    %c0_i32_2 = arith.constant 0 : i32
    return %arg0, %c0_i32, %c0_i32_0, %c0_i32_1 : i32, i32, i32, i32
  }
  func.func @transform_1(%arg0: i32, %arg1: i32) -> (i32, i32) {
    %c0_i32 = arith.constant 0 : i32
    %c0_i32_0 = arith.constant 0 : i32
    %c0_i32_1 = arith.constant 0 : i32
    return %c0_i32, %c0_i32_0 : i32, i32
  }
  func.func @transform_2(%arg0: i32, %arg1: i32) -> (i32, i32, i32, i32) {
    %c0_i32 = arith.constant 0 : i32
    %c0_i32_0 = arith.constant 0 : i32
    %c0_i32_1 = arith.constant 0 : i32
    return %arg0, %arg1, %c0_i32, %c0_i32_0 : i32, i32, i32, i32
  }
}

module attributes {stable_mosaic.version = 11 : i64} {
  func.func @_conv_bn_relu_kernel(%arg0: i32, %arg1: i32, %arg2: memref<1x18x18x4xbf16, #tpu.memory_space<vmem>>, %arg3: memref<36x128xbf16, #tpu.memory_space<vmem>>, %arg4: memref<1x128xf32, #tpu.memory_space<vmem>>, %arg5: memref<1x128xf32, #tpu.memory_space<vmem>>, %arg6: memref<1x128x128xf32, #tpu.memory_space<vmem>>) attributes {dimension_semantics = [#tpu.dimension_semantics<parallel>, #tpu.dimension_semantics<parallel>], iteration_bounds = array<i64: 2, 2>, scalar_prefetch = 0 : i64, scratch_operands = 0 : i64, tpu.core_type = #tpu.core_type<tc>, window_params = [{transform_indices = @transform_0, window_bounds = array<i64: 1, 18, 18, 4>}, {pipeline_mode = #tpu.pipeline_mode<synchronous>, transform_indices = @transform_1, window_bounds = array<i64: 36, 128>}, {pipeline_mode = #tpu.pipeline_mode<synchronous>, transform_indices = @transform_2, window_bounds = array<i64: 1, 128>}, {pipeline_mode = #tpu.pipeline_mode<synchronous>, transform_indices = @transform_3, window_bounds = array<i64: 1, 128>}, {transform_indices = @transform_4, window_bounds = array<i64: 1, 128, 128>}]} {
    %c8_i32 = arith.constant 8 : i32
    %0 = arith.muli %arg1, %c8_i32 : i32
    %1 = tpu.assume_multiple %0, 8 : i32
    %c0_i32 = arith.constant 0 : i32
    %2 = arith.addi %1, %c0_i32 : i32
    %c0 = arith.constant 0 : index
    %3 = arith.index_cast %2 : i32 to index
    %c0_0 = arith.constant 0 : index
    %c0_1 = arith.constant 0 : index
    %4 = vector.load %arg2[%c0, %3, %c0_0, %c0_1] : memref<1x18x18x4xbf16, #tpu.memory_space<vmem>>, vector<1x8x18x4xbf16>
    %5 = vector.shape_cast %4 : vector<1x8x18x4xbf16> to vector<8x18x4xbf16>
    %6 = vector.extract_strided_slice %5 {offsets = [0, 0, 0], sizes = [8, 16, 4], strides = [1, 1, 1]} : vector<8x18x4xbf16> to vector<8x16x4xbf16>
    %7 = vector.extract_strided_slice %5 {offsets = [0, 1, 0], sizes = [8, 16, 4], strides = [1, 1, 1]} : vector<8x18x4xbf16> to vector<8x16x4xbf16>
    %8 = vector.extract_strided_slice %5 {offsets = [0, 2, 0], sizes = [8, 16, 4], strides = [1, 1, 1]} : vector<8x18x4xbf16> to vector<8x16x4xbf16>
    %c1_i32 = arith.constant 1 : i32
    %9 = arith.addi %1, %c1_i32 : i32
    %c0_2 = arith.constant 0 : index
    %10 = arith.index_cast %9 : i32 to index
    %c0_3 = arith.constant 0 : index
    %c0_4 = arith.constant 0 : index
    %11 = vector.load %arg2[%c0_2, %10, %c0_3, %c0_4] : memref<1x18x18x4xbf16, #tpu.memory_space<vmem>>, vector<1x8x18x4xbf16>
    %12 = vector.shape_cast %11 : vector<1x8x18x4xbf16> to vector<8x18x4xbf16>
    %13 = vector.extract_strided_slice %12 {offsets = [0, 0, 0], sizes = [8, 16, 4], strides = [1, 1, 1]} : vector<8x18x4xbf16> to vector<8x16x4xbf16>
    %14 = vector.extract_strided_slice %12 {offsets = [0, 1, 0], sizes = [8, 16, 4], strides = [1, 1, 1]} : vector<8x18x4xbf16> to vector<8x16x4xbf16>
    %15 = vector.extract_strided_slice %12 {offsets = [0, 2, 0], sizes = [8, 16, 4], strides = [1, 1, 1]} : vector<8x18x4xbf16> to vector<8x16x4xbf16>
    %c2_i32 = arith.constant 2 : i32
    %16 = arith.addi %1, %c2_i32 : i32
    %c0_5 = arith.constant 0 : index
    %17 = arith.index_cast %16 : i32 to index
    %c0_6 = arith.constant 0 : index
    %c0_7 = arith.constant 0 : index
    %18 = vector.load %arg2[%c0_5, %17, %c0_6, %c0_7] : memref<1x18x18x4xbf16, #tpu.memory_space<vmem>>, vector<1x8x18x4xbf16>
    %19 = vector.shape_cast %18 : vector<1x8x18x4xbf16> to vector<8x18x4xbf16>
    %20 = vector.extract_strided_slice %19 {offsets = [0, 0, 0], sizes = [8, 16, 4], strides = [1, 1, 1]} : vector<8x18x4xbf16> to vector<8x16x4xbf16>
    %21 = vector.extract_strided_slice %19 {offsets = [0, 1, 0], sizes = [8, 16, 4], strides = [1, 1, 1]} : vector<8x18x4xbf16> to vector<8x16x4xbf16>
    %22 = vector.extract_strided_slice %19 {offsets = [0, 2, 0], sizes = [8, 16, 4], strides = [1, 1, 1]} : vector<8x18x4xbf16> to vector<8x16x4xbf16>
    %23 = tpu.concatenate %6, %7, %8, %13, %14, %15, %20, %21, %22 in 2 : vector<8x16x4xbf16>, vector<8x16x4xbf16>, vector<8x16x4xbf16>, vector<8x16x4xbf16>, vector<8x16x4xbf16>, vector<8x16x4xbf16>, vector<8x16x4xbf16>, vector<8x16x4xbf16>, vector<8x16x4xbf16> -> vector<8x16x36xbf16>
    %24 = vector.shape_cast %23 : vector<8x16x36xbf16> to vector<128x36xbf16>
    %c0_8 = arith.constant 0 : index
    %c0_9 = arith.constant 0 : index
    %25 = vector.load %arg3[%c0_8, %c0_9] : memref<36x128xbf16, #tpu.memory_space<vmem>>, vector<36x128xbf16>
    %cst = arith.constant dense<0.000000e+00> : vector<128x128xf32>
    %26 = tpu.matmul %24, %25, %cst {dimension_numbers = #tpu.dot_dimension_numbers<[1], [0], [0], [1], [0, 0, 1, 1], [], []>} : vector<128x36xbf16>, vector<36x128xbf16>, vector<128x128xf32> -> vector<128x128xf32>
    %c0_10 = arith.constant 0 : index
    %c0_11 = arith.constant 0 : index
    %27 = vector.load %arg4[%c0_10, %c0_11] : memref<1x128xf32, #tpu.memory_space<vmem>>, vector<1x128xf32>
    %28 = vector.broadcast %27 : vector<1x128xf32> to vector<128x128xf32>
    %29 = arith.mulf %26, %28 : vector<128x128xf32>
    %c0_12 = arith.constant 0 : index
    %c0_13 = arith.constant 0 : index
    %30 = vector.load %arg5[%c0_12, %c0_13] : memref<1x128xf32, #tpu.memory_space<vmem>>, vector<1x128xf32>
    %31 = vector.broadcast %30 : vector<1x128xf32> to vector<128x128xf32>
    %32 = arith.addf %29, %31 : vector<128x128xf32>
    %cst_14 = arith.constant 0.000000e+00 : f32
    %33 = vector.broadcast %cst_14 : f32 to vector<128x128xf32>
    %34 = arith.maximumf %32, %33 : vector<128x128xf32>
    %c0_15 = arith.constant 0 : index
    %c0_16 = arith.constant 0 : index
    %c0_17 = arith.constant 0 : index
    %35 = vector.load %arg6[%c0_15, %c0_16, %c0_17] : memref<1x128x128xf32, #tpu.memory_space<vmem>>, vector<1x128x128xf32>
    %36 = vector.shape_cast %35 : vector<1x128x128xf32> to vector<128x128xf32>
    %37 = vector.shape_cast %34 : vector<128x128xf32> to vector<1x128x128xf32>
    tpu.vector_store %arg6[%c0_15, %c0_16, %c0_17], %37 {strides = array<i32>} : memref<1x128x128xf32, #tpu.memory_space<vmem>>, vector<1x128x128xf32>,
    return
  }
  func.func @transform_0(%arg0: i32, %arg1: i32) -> (i32, i32, i32, i32) {
    %c0_i32 = arith.constant 0 : i32
    %c0_i32_0 = arith.constant 0 : i32
    %c0_i32_1 = arith.constant 0 : i32
    %c0_i32_2 = arith.constant 0 : i32
    return %arg0, %c0_i32, %c0_i32_0, %c0_i32_1 : i32, i32, i32, i32
  }
  func.func @transform_1(%arg0: i32, %arg1: i32) -> (i32, i32) {
    %c0_i32 = arith.constant 0 : i32
    %c0_i32_0 = arith.constant 0 : i32
    %c0_i32_1 = arith.constant 0 : i32
    return %c0_i32, %c0_i32_0 : i32, i32
  }
  func.func @transform_2(%arg0: i32, %arg1: i32) -> (i32, i32) {
    %c0_i32 = arith.constant 0 : i32
    %c0_i32_0 = arith.constant 0 : i32
    %c0_i32_1 = arith.constant 0 : i32
    return %c0_i32, %c0_i32_0 : i32, i32
  }
  func.func @transform_3(%arg0: i32, %arg1: i32) -> (i32, i32) {
    %c0_i32 = arith.constant 0 : i32
    %c0_i32_0 = arith.constant 0 : i32
    %c0_i32_1 = arith.constant 0 : i32
    return %c0_i32, %c0_i32_0 : i32, i32
  }
  func.func @transform_4(%arg0: i32, %arg1: i32) -> (i32, i32, i32) {
    %c0_i32 = arith.constant 0 : i32
    %c0_i32_0 = arith.constant 0 : i32
    return %arg0, %arg1, %c0_i32 : i32, i32, i32
  }
}

</mosaic_0001>

<bundles_post_ra>
// kernel: _conv_bn_relu_impl.2
= control target key start
LH: loop header
LB: loop body
LE: loop exit
PB: predicated region body
PF: predicated region fallthrough
CT: control target
= control target key end

     0   :  { %s1685_s9 = smov 0   ;;  %s1687_s10 = smov 0   ;;  %s2092_s0 = inlined_call_operand.vmem [shape: bf16[2,18,18,4], index: 0, kind: input, shape index: {}]   ;;  %s2093_s1 = inlined_call_operand.vmem [shape: bf16[36,128], index: 1, kind: input, shape index: {}]   ;;  %s2094_s2 = inlined_call_operand.vmem [shape: f32[2,2,2,128], index: 2, kind: output, shape index: {}]  }
   0x1   :  { %s1689_s11 = smov 0   ;;  %s1691_s12 = smov 0  }
   0x2   :  { %s1693_s13 = smov 0  }
   0x3 LB: > { %s21_s14 = sadd.s32 1, %s1652_s11  ;;  %s24_s15 = sadd.s32 1, %s1656_s12  ;;  %s1660_s13 = sphi %s1693_s13, %s12_s13   ;;  %s1656_s12 = sphi %s1691_s12, %s2098_s12   ;;  %s1652_s11 = sphi %s1689_s11, %s2097_s11   ;;  %s1648_s10 = sphi %s1687_s10, %s2096_s10   ;;  %s1644_s9 = sphi %s1685_s9, %s2095_s9  }
   0x4   : > { %p22_p0 = scmp.ge.s32.totalorder %s21_s14, 2  ;;  %p1360_p1 = scmp.ge.s32.totalorder %s1660_s13, 1 }
   0x5   : > { %p126_p2 = scmp.lt.s32.totalorder %s1660_s13, 5 }
   0x6   : > { %s2100_s14 = smov (%p22_p0, %s21_s14), 0  ;;  %s2102_s15 = smov (!%p22_p0, %s24_s15), %s1656_s12 }
   0x7   : > { %p127_p3 = pnand %p1360_p1, %p126_p2  ;;  %p26_p4 = scmp.ge.s32.totalorder %s2102_s15, 2 }
   0x8   : > { %p151_p5 = scmp.lt.s32.totalorder (!%p127_p3), %s1648_s10, 1  ;;  %s1480_s16 = smul.u32 (!%p127_p3), 96, %s1644_s9  ;;  %vm426_vm0 = vcmask (!%p127_p3), 1046528   ;;  %vm313_vm1 = vsmask.f32 (!%p127_p3), 7424  ;;  %vm1104_vm2 = vcmask (!%p127_p3), 1041408  }
   0x9   : > { %s2104_s15 = smov (%p26_p4, %s2102_s15), 0  ;;  %130 = sbr.rel (%p127_p3) target bundleno = 501 (0x1f5), region = 28 }
   0xa   : > { %s1662_s22 = smov (!%p127_p3), 12   ;;  %s1663_s23 = smov (!%p127_p3), 20   ;;  %vm931_vm3 = vcmask (!%p127_p3), 31744   ;;  %vm948_vm4 = vcmask (!%p127_p3), 64512   ;;  %vm965_vm5 = vcmask (!%p127_p3), 97280   ;;  %vm982_vm6 = vcmask (!%p127_p3), 130048  }
   0xb   : > { %s1664_s24 = smov (!%p127_p3), 8   ;;  %s1665_s25 = smov (!%p127_p3), 4   ;;  %vm999_vm7 = vcmask (!%p127_p3), 162816   ;;  %vm1016_vm8 = vcmask (!%p127_p3), 195584   ;;  %vm1033_vm9 = vcmask (!%p127_p3), 228352   ;;  %vm1050_vm10 = vcmask (!%p127_p3), 261120  }
   0xc   : > { %s1666_s26 = smov (!%p127_p3), 16   ;;  %s1667_s27 = smov (!%p127_p3), 24   ;;  %vm1087_vm11 = vcmask (!%p127_p3), 293888   ;;  %vm1263_vm12 = vcmask (!%p127_p3), 1040384  }
   0xd   : > { %s1668_s28 = smov (!%p127_p3), 28   ;;  %s1669_s29 = smov (!%p127_p3), 32  }
   0xe   : > { %p158_p6 = scmp.lt.s32.totalorder (!%p127_p3), %s1644_s9, 1 }
  0x10   : > { %s2106_s10 = smov (!%p151_p5, %s1648_s10), 1  ;;  %s2108_s9 = smov (!%p158_p6, %s1644_s9), 1 }
  0x11   : > { %s1522_s17 = smul.u32 216, %s2106_s10  ;;  %s1362_s8 = sshll.u32 %s2106_s10, 1 }
  0x13   : > { %s155_s20 = scalar_lea.vmem %s2092_s0, %s1522_s17 }
  0x14   : > { %s1724_s21 = scalar_lea.vmem %s155_s20, %s1480_s16  ;;  %s161_s16 = sadd.s32 %s1362_s8, %s2108_s9 }
  0x15   : > { %v1571_v0 = vld [vmem:[%s1724_s21 + $0x18] sm:$0xff]   ;;  %v1572_v1 = vld [vmem:[%s1724_s21 + $0xc] sm:$0xff]   ;;  %v1573_v2 = vld [vmem:[%s1724_s21 + $0x14] ss:$0 sps:$4 sm:$0x11]   ;;  %s1363_s17 = sshll.u32 %s161_s16, 1 }
  0x16   : > { %509 = vrot.lane.b32.xlu1 %v1571_v0, %s1662_s22  ;;  %v1731_v3 = vld [vmem:[%s1724_s21] sm:$0xff]   ;;  %507 = vrot.lane.b32.xlu0 %v1572_v1, %s1662_s22  ;;  %v659_v4 = vrot.slane %v1572_v1, 1  ;;  %v1735_v5 = vld [vmem:[%s1724_s21 + $0xc] sm:$0xff]   ;;  %v660_v6 = vrot.slane %v1573_v2, 1  ;;  %v662_v16 = vrot.slane %v1571_v0, 1  ;;  %v560_v25 = vshrl.u32 %v1571_v0, 16  ;;  %s163_s20 = scalar_lea.vmem %s2094_s2, %s1363_s17 }
  0x17   : > { %v1575_v7 = vld [vmem:[%s1724_s21 + $0x8] ss:$0 sps:$4 sm:$0x11]   ;;  %v427_v8 = vrot.slane %v1731_v3, 1  ;;  %v430_v9 = vrot.slane %v1735_v5, 1  ;;  %v315_v13 = vshrl.u32 %v1731_v3, 16 }
  0x18   : > { %v661_v10 = vsel %vm426_vm0, %v659_v4, %v660_v6  ;;  %v428_v11 = vrot.slane %v1575_v7, 1  ;;  %v1577_v12 = vld [vmem:[%s1724_s21 + $0x14] ss:$0 sps:$4 sm:$0x11]   ;;  %v317_v14 = vshll.u32 %v1731_v3, 16  ;;  %v322_v15 = vshll.u32 %v1575_v7, 16 }
  0x19   : > { %v431_v18 = vrot.slane %v1577_v12, 1  ;;  %v1578_v19 = vld [vmem:[%s1724_s21 + $0x20] ss:$0 sps:$4 sm:$0x11]   ;;  %v327_v20 = vshrl.u32 %v1735_v5, 16  ;;  %v329_v21 = vshll.u32 %v1735_v5, 16 }
  0x1a   : > { %683 = vrot.lane.b32.xlu0 %v661_v10, %s1663_s23  ;;  %v429_v17 = vsel %vm426_vm0, %v427_v8, %v428_v11  ;;  %v319_v22 = vrot.slane %v317_v14, 1  ;;  %v324_v23 = vrot.slane %v322_v15, 1  ;;  %v334_v24 = vshll.u32 %v1577_v12, 16  ;;  %v1752_v30 = vld [vmem:[%s1724_s21 + $0x24] sm:$0xff]   ;;  %v1755_v35 = vld [vmem:[%s1724_s21 + $0x18] sm:$0xff]  }
  0x1b   : > { %451 = vrot.lane.b32.xlu1 %v429_v17, %s1664_s24  ;;  %v432_v26 = vsel %vm426_vm0, %v430_v9, %v431_v18  ;;  %v663_v27 = vrot.slane %v1578_v19, 1  ;;  %v331_v28 = vrot.slane %v329_v21, 1  ;;  %v562_v29 = vshll.u32 %v1571_v0, 16  ;;  %v1760_v42 = vld [vmem:[%s1724_s21 + $0x2c] ss:$0 sps:$4 sm:$0x11]  }
  0x1c   : > { %v320_v31 = vor.u32 %v319_v22, %v315_v13  ;;  %v336_v32 = vrot.slane %v334_v24, 1  ;;  %v567_v33 = vshll.u32 %v1578_v19, 16  ;;  %v548_v34 = vshrl.u32 %v1572_v1, 16  ;;  %v1582_v49 = vld [vmem:[%s1724_s21 + $0x20] ss:$0 sps:$4 sm:$0x11]  }
  0x1d   : > { %v332_v36 = vor.u32 %v331_v28, %v327_v20  ;;  %v564_v37 = vrot.slane %v562_v29, 1  ;;  %v550_v38 = vshll.u32 %v1572_v1, 16  ;;  %v555_v41 = vshll.u32 %v1573_v2, 16  ;;  %v1772_v55 = vld [vmem:[%s1724_s21 + $0x18] sm:$0xff]   ;;  %v1783_v0 = vld [vmem:[%s1724_s21 + $0x24] sm:$0xff]  }
  0x1e   : > { %v325_v39 = vsel %vm313_vm1, %v320_v31, %v324_v23  ;;  %v569_v40 = vrot.slane %v567_v33, 1  ;;  %v664_v43 = vsel %vm426_vm0, %v662_v16, %v663_v27  ;;  %v794_v46 = vshll.u32 %v1752_v30, 16  ;;  %v1775_v56 = vld [vmem:[%s1724_s21 + $0x20] ss:$0 sps:$4 sm:$0x11]   ;;  %v1587_v23 = vld [vmem:[%s1724_s21 + $0x30] sm:$0xff]  }
  0x1f   : > { %453 = vrot.lane.b32.xlu1 %v432_v26, %s1664_s24  ;;  %410 = vrot.lane.b32.xlu0 %v325_v39, %s1665_s25  ;;  %v565_v44 = vor.u32 %v564_v37, %v560_v25  ;;  %v552_v45 = vrot.slane %v550_v38, 1  ;;  %v337_v47 = vsel %vm313_vm1, %v332_v36, %v336_v32  ;;  %v557_v48 = vrot.slane %v555_v41, 1  ;;  %v1586_v4 = vld [vmem:[%s1724_s21 + $0x2c] ss:$0 sps:$4 sm:$0x11]   ;;  %v1588_v27 = vld [vmem:[%s1724_s21 + $0x24] sm:$0xff]  }
  0x20   : > { %v799_v51 = vshll.u32 %v1760_v42, 16  ;;  %v782_v52 = vshll.u32 %v1755_v35, 16  ;;  %v792_v53 = vshrl.u32 %v1752_v30, 16  ;;  %v796_v54 = vrot.slane %v794_v46, 1 }
  0x21   : > { %v553_v50 = vor.u32 %v552_v45, %v548_v34  ;;  %v570_v57 = vsel %vm313_vm1, %v565_v44, %v569_v40  ;;  %v780_v58 = vshrl.u32 %v1755_v35, 16  ;;  %v787_v61 = vshll.u32 %v1582_v49, 16  ;;  %v1589_v32 = vld [vmem:[%s1724_s21 + $0x38] ss:$0 sps:$4 sm:$0x11]  }
  0x22   : > { %v784_v60 = vrot.slane %v782_v52, 1  ;;  %v341_v62 = vshll.u32 %v1772_v55, 16  ;;  %v801_v63 = vrot.slane %v799_v51, 1  ;;  %v797_v1 = vor.u32 %v796_v54, %v792_v53  ;;  %v1590_v36 = vld [vmem:[%s1724_s21 + $0x2c] ss:$0 sps:$4 sm:$0x11]  }
  0x23   : > { %685 = vrot.lane.b32.xlu1 %v664_v43, %s1663_s23  ;;  %412 = vrot.lane.b32.xlu0 %v337_v47, %s1665_s25  ;;  %v558_v59 = vsel %vm313_vm1, %v553_v50, %v557_v48  ;;  %v346_v2 = vshll.u32 %v1775_v56, 16  ;;  %v339_v6 = vshrl.u32 %v1772_v55, 16  ;;  %v353_v8 = vshll.u32 %v1783_v0, 16  ;;  %v1823_v48 = vld [vmem:[%s1724_s21 + $0x3c] sm:$0xff]   ;;  %v1592_v51 = vld [vmem:[%s1724_s21 + $0x30] sm:$0xff]  }
  0x24   : > { %v343_v7 = vrot.slane %v341_v62, 1  ;;  %v785_v9 = vor.u32 %v784_v60, %v780_v58  ;;  %v789_v10 = vrot.slane %v787_v61, 1  ;;  %v802_v11 = vsel %vm313_vm1, %v797_v1, %v801_v63  ;;  %v1827_v52 = vld [vmem:[%s1724_s21 + $0x44] ss:$0 sps:$4 sm:$0x11]  }
  0x25   : > { %v348_v12 = vrot.slane %v346_v2, 1  ;;  %v351_v14 = vshrl.u32 %v1783_v0, 16  ;;  %v355_v15 = vrot.slane %v353_v8, 1  ;;  %v358_v16 = vshll.u32 %v1586_v4, 16 }
  0x26   : > { %v344_v13 = vor.u32 %v343_v7, %v339_v6  ;;  %v790_v17 = vsel %vm313_vm1, %v785_v9, %v789_v10  ;;  %v891_v18 = vrot.slane %v1755_v35, 1  ;;  %v892_v19 = vrot.slane %v1582_v49, 1  ;;  %v1594_v60 = vld [vmem:[%s1724_s21 + $0x38] ss:$0 sps:$4 sm:$0x11]   ;;  %v1848_v9 = vld [vmem:[%s1724_s21 + $0x3c] sm:$0xff]  }
  0x27   : > { %645 = vrot.lane.b32.xlu1 %v570_v57, %s1666_s26  ;;  %643 = vrot.lane.b32.xlu0 %v558_v59, %s1666_s26  ;;  %v356_v21 = vor.u32 %v355_v15, %v351_v14  ;;  %v360_v22 = vrot.slane %v358_v16, 1  ;;  %v894_v25 = vrot.slane %v1752_v30, 1  ;;  %v895_v26 = vrot.slane %v1760_v42, 1  ;;  %v1831_v57 = vld [vmem:[%s1724_s21 + $0x30] sm:$0xff]  }
  0x28   : > { %v349_v20 = vsel %vm313_vm1, %v344_v13, %v348_v12  ;;  %v893_v24 = vsel %vm426_vm0, %v891_v18, %v892_v19  ;;  %v436_v28 = vrot.slane %v1783_v0, 1  ;;  %v437_v29 = vrot.slane %v1586_v4, 1  ;;  %v1842_v4 = vld [vmem:[%s1724_s21 + $0x38] ss:$0 sps:$4 sm:$0x11]  }
  0x29   : > { %v361_v31 = vsel %vm313_vm1, %v356_v21, %v360_v22  ;;  %v586_v33 = vshll.u32 %v1587_v23, 16  ;;  %v896_v34 = vsel %vm426_vm0, %v894_v25, %v895_v26  ;;  %v574_v37 = vshll.u32 %v1588_v27, 16  ;;  %v1598_v19 = vld [vmem:[%s1724_s21 + $0x44] ss:$0 sps:$4 sm:$0x11]  }
  0x2a   : > { %v584_v38 = vshrl.u32 %v1587_v23, 16  ;;  %v438_v39 = vsel %vm426_vm0, %v436_v28, %v437_v29  ;;  %v591_v41 = vshll.u32 %v1589_v32, 16  ;;  %v572_v43 = vshrl.u32 %v1588_v27, 16 }
  0x2b   : > { %741 = vrot.lane.b32.xlu1 %v1752_v30, %s1667_s27  ;;  %739 = vrot.lane.b32.xlu0 %v1755_v35, %s1667_s27  ;;  %v433_v35 = vrot.slane %v1772_v55, 1  ;;  %v434_v30 = vrot.slane %v1775_v56, 1  ;;  %v588_v40 = vrot.slane %v586_v33, 1  ;;  %v576_v44 = vrot.slane %v574_v37, 1 }
  0x2c   : > { %v579_v45 = vshll.u32 %v1590_v36, 16  ;;  %v593_v47 = vrot.slane %v591_v41, 1  ;;  %v668_v53 = vrot.slane %v1587_v23, 1  ;;  %v669_v54 = vrot.slane %v1589_v32, 1 }
  0x2d   : > { %v435_v42 = vsel %vm426_vm0, %v433_v35, %v434_v30  ;;  %v589_v46 = vor.u32 %v588_v40, %v584_v38  ;;  %v577_v49 = vor.u32 %v576_v44, %v572_v43  ;;  %v665_v56 = vrot.slane %v1588_v27, 1  ;;  %v1867_v30 = vld [vmem:[%s1724_s21 + $0x48] sm:$0xff]   ;;  %v1619_v40 = vld [vmem:[%s2093_s1] sm:$0xff]  }
  0x2e   : > { %v581_v50 = vrot.slane %v579_v45, 1  ;;  %v818_v59 = vshll.u32 %v1823_v48, 16  ;;  %v666_v62 = vrot.slane %v1590_v36, 1  ;;  %v806_v63 = vshll.u32 %v1592_v51, 16  ;;  %1492 = vmatprep.subr.bf16.mxu0 %v1619_v40  ;;  %1514 = vmatprep.subr.bf16.mxu1 %v1619_v40 }
  0x2f   : > { %877 = vrot.lane.b32.xlu1 %v802_v11, %s1668_s28  ;;  %875 = vrot.lane.b32.xlu0 %v790_v17, %s1668_s28  ;;  %v594_v58 = vsel %vm313_vm1, %v589_v46, %v593_v47  ;;  %v823_v1 = vshll.u32 %v1827_v52, 16  ;;  %v816_v2 = vshrl.u32 %v1823_v48, 16  ;;  %v365_v6 = vshll.u32 %v1831_v57, 16  ;;  %v1601_v45 = vld [vmem:[%s1724_s21 + $0x50] ss:$0 sps:$4 sm:$0x11]  }
  0x30   : > { %v582_v61 = vsel %vm313_vm1, %v577_v49, %v581_v50  ;;  %v670_v7 = vsel %vm426_vm0, %v668_v53, %v669_v54  ;;  %v820_v8 = vrot.slane %v818_v59, 1  ;;  %v667_v10 = vsel %vm426_vm0, %v665_v56, %v666_v62  ;;  %1493 = vmatpush3.bf16.msra.mxu0 %v1619_v40  ;;  %v1602_v49 = vld [vmem:[%s1724_s21 + $0x44] ss:$0 sps:$4 sm:$0x11]   ;;  %1517 = vmatpush3.bf16.msra.mxu1 %v1619_v40 }
  0x31   : > { %v804_v11 = vshrl.u32 %v1592_v51, 16  ;;  %v808_v12 = vrot.slane %v806_v63, 1  ;;  %v811_v13 = vshll.u32 %v1594_v60, 16  ;;  %v825_v14 = vrot.slane %v823_v1, 1  ;;  %v1903_v63 = vld [vmem:[%s1724_s21 + $0x54] sm:$0xff]  }
  0x32   : > { %v363_v15 = vshrl.u32 %v1831_v57, 16  ;;  %v367_v16 = vrot.slane %v365_v6, 1  ;;  %v370_v17 = vshll.u32 %v1842_v4, 16  ;;  %v821_v18 = vor.u32 %v820_v8, %v816_v2  ;;  %v1604_v8 = vld [vmem:[%s1724_s21 + $0x48] sm:$0xff]  }
  0x33   : > { %414 = vrot.lane.b32.xlu1 %v349_v20, %s1665_s25  ;;  %915 = vrot.lane.b32.xlu0 %v893_v24, %s1669_s29  ;;  %v377_v20 = vshll.u32 %v1848_v9, 16  ;;  %v809_v21 = vor.u32 %v808_v12, %v804_v11  ;;  %v813_v22 = vrot.slane %v811_v13, 1  ;;  %v375_v24 = vshrl.u32 %v1848_v9, 16  ;;  %v1914_v12 = vld [vmem:[%s1724_s21 + $0x48] sm:$0xff]  }
  0x34   : > { %v826_v25 = vsel %vm313_vm1, %v821_v18, %v825_v14  ;;  %v368_v26 = vor.u32 %v367_v16, %v363_v15  ;;  %v382_v28 = vshll.u32 %v1598_v19, 16  ;;  %v898_v32 = vrot.slane %v1594_v60, 1 }
  0x35   : > { %v814_v29 = vsel %vm313_vm1, %v809_v21, %v813_v22  ;;  %v900_v37 = vrot.slane %v1823_v48, 1  ;;  %v901_v38 = vrot.slane %v1827_v52, 1  ;;  %v442_v41 = vrot.slane %v1848_v9, 1  ;;  %v1621_v52 = vld [vmem:[%s2093_s1 + $0x10] ss:$0 sps:$4 sm:$0x33]  }
  0x36   : > { %v384_v35 = vrot.slane %v382_v28, 1  ;;  %v443_v43 = vrot.slane %v1598_v19, 1  ;;  %v439_v44 = vrot.slane %v1831_v57, 1  ;;  %v610_v46 = vshll.u32 %v1867_v30, 16 }
  0x37   : > { %416 = vrot.lane.b32.xlu1 %v361_v31, %s1665_s25  ;;  %917 = vrot.lane.b32.xlu0 %v896_v34, %s1669_s29  ;;  %v897_v31 = vrot.slane %v1592_v51, 1  ;;  %v902_v47 = vsel %vm426_vm0, %v900_v37, %v901_v38  ;;  %v608_v54 = vshrl.u32 %v1867_v30, 16  ;;  %v603_v62 = vshll.u32 %v1602_v49, 16  ;;  %v1606_v19 = vld [vmem:[%s1724_s21 + $0x50] ss:$0 sps:$4 sm:$0x11]  }
  0x38   : > { %v444_v53 = vsel %vm426_vm0, %v442_v41, %v443_v43  ;;  %v612_v56 = vrot.slane %v610_v46, 1  ;;  %v1106_v1 = vsel %vm1104_vm2, %v1621_v52, 0  ;;  %v842_v11 = vshll.u32 %v1903_v63, 16  ;;  %v1610_v37 = vld [vmem:[%s1724_s21 + $0x5c] ss:$0 sps:$4 sm:$0x11]  }
  0x39   : > { %v899_v36 = vsel %vm426_vm0, %v897_v31, %v898_v32  ;;  %v674_v14 = vrot.slane %v1867_v30, 1  ;;  %v675_v15 = vrot.slane %v1601_v45, 1  ;;  %v672_v18 = vrot.slane %v1602_v49, 1 }
  0x3a   : > { %v613_v2 = vor.u32 %v612_v56, %v608_v54  ;;  %v840_v21 = vshrl.u32 %v1903_v63, 16  ;;  %v844_v22 = vrot.slane %v842_v11, 1  ;;  %v835_v32 = vshll.u32 %v1606_v19, 16 }
  0x3b   : > { %457 = vrot.lane.b32.xlu1 %v438_v39, %s1664_s24  ;;  %455 = vrot.lane.b32.xlu0 %v435_v42, %s1664_s24  ;;  %v1873_v39 = vld [vmem:[%s1724_s21 + $0x3c] sm:$0xff]   ;;  %v406_v46 = vshll.u32 %v1610_v37, 16  ;;  %v904_v49 = vrot.slane %v1606_v19, 1  ;;  %v906_v56 = vrot.slane %v1903_v63, 1 }
  0x3c   : > { %v598_v50 = vshll.u32 %v1873_v39, 16  ;;  %v596_v60 = vshrl.u32 %v1873_v39, 16  ;;  %v837_v40 = vrot.slane %v835_v32, 1 }
  0x3f   : > { %513 = vrot.lane.b32.xlu1 %v1587_v23, %s1662_s22  ;;  %511 = vrot.lane.b32.xlu0 %v1588_v27, %s1662_s22  ;;  %v372_v23 = vrot.slane %v370_v17, 1  ;;  %v379_v27 = vrot.slane %v377_v20, 1  ;;  %v671_v17 = vrot.slane %v1873_v39, 1  ;;  %v830_v20 = vshll.u32 %v1604_v8, 16 }
  0x41   : > { %v373_v33 = vsel %vm313_vm1, %v368_v26, %v372_v23  ;;  %v380_v34 = vor.u32 %v379_v27, %v375_v24  ;;  %v389_v24 = vshll.u32 %v1914_v12, 16  ;;  %v1608_v26 = vld [vmem:[%s1724_s21 + $0x50] ss:$0 sps:$4 sm:$0x11]   ;;  %v1931_v27 = vld [vmem:[%s1724_s21 + $0x54] sm:$0xff]   ;;  %v673_v28 = vsel %vm426_vm0, %v671_v17, %v672_v18 }
  0x42   : > { %v832_v31 = vrot.slane %v830_v20, 1  ;;  %v401_v38 = vshll.u32 %v1931_v27, 16 }
  0x43   : > { %649 = vrot.lane.b32.xlu1 %v594_v58, %s1666_s26  ;;  %647 = vrot.lane.b32.xlu0 %v582_v61, %s1666_s26  ;;  %v385_v42 = vsel %vm313_vm1, %v380_v34, %v384_v35  ;;  %v615_v58 = vshll.u32 %v1601_v45, 16  ;;  %v600_v61 = vrot.slane %v598_v50, 1  ;;  %v387_v35 = vshrl.u32 %v1914_v12, 16 }
  0x44   : > { %v403_v45 = vrot.slane %v401_v38, 1 }
  0x45   : > { %v601_v6 = vor.u32 %v600_v61, %v596_v60  ;;  %v448_v61 = vrot.slane %v1931_v27, 1 }
  0x47   : > { %689 = vrot.lane.b32.xlu1 %v670_v7, %s1663_s23  ;;  %687 = vrot.lane.b32.xlu0 %v667_v10, %s1663_s23  ;;  %v605_v7 = vrot.slane %v603_v62, 1  ;;  %v1910_v10 = vld [vmem:[%s1724_s21 + $0x5c] ss:$0 sps:$4 sm:$0x11]   ;;  %v449_v62 = vrot.slane %v1610_v37, 1 }
  0x48   : > { %v847_v23 = vshll.u32 %v1910_v10, 16 }
  0x49   : > { %v606_v16 = vsel %vm313_vm1, %v601_v6, %v605_v7  ;;  %v445_v6 = vrot.slane %v1914_v12, 1  ;;  %v446_v7 = vrot.slane %v1608_v26, 1 }
  0x4a   : > { %v849_v34 = vrot.slane %v847_v23, 1 }
  0x4b   : > { %745 = vrot.lane.b32.xlu1 %v1823_v48, %s1667_s27  ;;  %743 = vrot.lane.b32.xlu0 %v1592_v51, %s1667_s27  ;;  %v440_v48 = vrot.slane %v1842_v4, 1  ;;  %v1620_v51 = vld [vmem:[%s2093_s1 + $0x8] sm:$0xff]   ;;  %v617_v4 = vrot.slane %v615_v58, 1  ;;  %v907_v58 = vrot.slane %v1910_v10, 1  ;;  %v450_v10 = vsel %vm426_vm0, %v448_v61, %v449_v62 }
  0x4c   : > { %1494 = vmatprep.subr.bf16.mxu0 %v1620_v51  ;;  %1515 = vmatprep.subr.bf16.mxu1 %v1620_v51 }
  0x4d   : > { %1495 = vmatpush3.bf16.msra.mxu0 %v1620_v51  ;;  %v441_v59 = vsel %vm426_vm0, %v439_v44, %v440_v48  ;;  %1518 = vmatpush3.bf16.msra.mxu1 %v1620_v51  ;;  %v618_v13 = vsel %vm313_vm1, %v613_v2, %v617_v4  ;;  %v399_v44 = vshrl.u32 %v1931_v27, 16  ;;  %v903_v48 = vrot.slane %v1604_v8, 1 }
  0x4e   : > { %1520 = vmatprep.subr.msk.bf16.mxu0 %vm1104_vm2, %v1621_v52  ;;  %1521 = vmatprep.subr.msk.bf16.mxu1 %vm1104_vm2, %v1621_v52  ;;  %v408_v52 = vrot.slane %v406_v46, 1  ;;  %v908_v4 = vsel %vm426_vm0, %v906_v56, %v907_v58 }
  0x4f   : > { %881 = vrot.lane.b32.xlu1 %v826_v25, %s1668_s28  ;;  %879 = vrot.lane.b32.xlu0 %v814_v29, %s1668_s28  ;;  %v676_v25 = vsel %vm426_vm0, %v674_v14, %v675_v15  ;;  %v828_v29 = vshrl.u32 %v1604_v8, 16  ;;  %v404_v51 = vor.u32 %v403_v45, %v399_v44  ;;  %v905_v54 = vsel %vm426_vm0, %v903_v48, %v904_v49 }
  0x50   : > { %v447_v15 = vsel %vm426_vm0, %v445_v6, %v446_v7 }
  0x51   : > { %1497 = vmatpush3.bf16.msra.mxu0 %v1106_v1  ;;  %1519 = vmatpush3.bf16.msra.mxu1 %v1106_v1  ;;  %v409_v60 = vsel %vm313_vm1, %v404_v51, %v408_v52  ;;  %v1613_v1 = vld [vmem:[%s1724_s21 + $0x68] ss:$0 sps:$4 sm:$0x11]  }
  0x52   : > { %v639_v14 = vshll.u32 %v1613_v1, 16 }
  0x53   : > { %418 = vrot.lane.b32.xlu1 %v373_v33, %s1665_s25  ;;  %919 = vrot.lane.b32.xlu0 %v899_v36, %s1669_s29  ;;  %v845_v33 = vor.u32 %v844_v22, %v840_v21  ;;  %v394_v36 = vshll.u32 %v1608_v26, 16  ;;  %v1615_v21 = vld [vmem:[%s1724_s21 + $0x6c] sm:$0xff]  }
  0x54   : > { %v641_v20 = vrot.slane %v639_v14, 1  ;;  %v864_v37 = vshrl.u32 %v1615_v21, 16  ;;  %v912_v52 = vrot.slane %v1615_v21, 1 }
  0x55   : > { %v850_v41 = vsel %vm313_vm1, %v845_v33, %v849_v34  ;;  %v396_v43 = vrot.slane %v394_v36, 1 }
  0x57   : > { %420 = vrot.lane.b32.xlu1 %v385_v42, %s1665_s25  ;;  %921 = vrot.lane.b32.xlu0 %v902_v47, %s1669_s29 }
  0x5b   : > { %461 = vrot.lane.b32.xlu1 %v444_v53, %s1664_s24  ;;  %459 = vrot.lane.b32.xlu0 %v441_v59, %s1664_s24  ;;  %v1611_v53 = vld [vmem:[%s1724_s21 + $0x60] sm:$0xff]   ;;  %v1612_v59 = vld [vmem:[%s1724_s21 + $0x54] sm:$0xff]  }
  0x5c   : > { %v634_v2 = vshll.u32 %v1611_v53, 16  ;;  %v632_v11 = vshrl.u32 %v1611_v53, 16  ;;  %v680_v26 = vrot.slane %v1611_v53, 1  ;;  %v677_v33 = vrot.slane %v1612_v59, 1 }
  0x5f   : > { %517 = vrot.lane.b32.xlu1 %v1867_v30, %s1662_s22  ;;  %515 = vrot.lane.b32.xlu0 %v1873_v39, %s1662_s22  ;;  %v391_v30 = vrot.slane %v389_v24, 1  ;;  %v833_v39 = vor.u32 %v832_v31, %v828_v29  ;;  %v1616_v24 = vld [vmem:[%s1724_s21 + $0x60] sm:$0xff]   ;;  %v1617_v29 = vld [vmem:[%s1724_s21 + $0x74] ss:$0 sps:$4 sm:$0x11]   ;;  %v866_v31 = vshll.u32 %v1615_v21, 16 }
  0x60   : > { %v909_v58 = vrot.slane %v1616_v24, 1 }
  0x61   : > { %v392_v42 = vor.u32 %v391_v30, %v387_v35  ;;  %v838_v47 = vsel %vm313_vm1, %v833_v39, %v837_v40  ;;  %v1618_v35 = vld [vmem:[%s1724_s21 + $0x68] ss:$0 sps:$4 sm:$0x11]   ;;  %v854_v30 = vshll.u32 %v1616_v24, 16  ;;  %v868_v38 = vrot.slane %v866_v31, 1 }
  0x62   : > { %v871_v39 = vshll.u32 %v1617_v29, 16 }
  0x63   : > { %653 = vrot.lane.b32.xlu1 %v618_v13, %s1666_s26  ;;  %651 = vrot.lane.b32.xlu0 %v606_v16, %s1666_s26  ;;  %v397_v50 = vsel %vm313_vm1, %v392_v42, %v396_v43  ;;  %v636_v13 = vrot.slane %v634_v2, 1  ;;  %v620_v16 = vshrl.u32 %v1612_v59, 16  ;;  %v856_v42 = vrot.slane %v854_v30, 1 }
  0x64   : > { %v859_v43 = vshll.u32 %v1618_v35, 16  ;;  %v869_v46 = vor.u32 %v868_v38, %v864_v37 }
  0x65   : > { %v637_v19 = vor.u32 %v636_v13, %v632_v11 }
  0x66   : > { %v861_v49 = vrot.slane %v859_v43, 1 }
  0x67   : > { %693 = vrot.lane.b32.xlu1 %v676_v25, %s1663_s23  ;;  %691 = vrot.lane.b32.xlu0 %v673_v28, %s1663_s23  ;;  %v642_v25 = vsel %vm313_vm1, %v637_v19, %v641_v20  ;;  %v681_v28 = vrot.slane %v1613_v1, 1 }
  0x69   : > { %v682_v36 = vsel %vm426_vm0, %v680_v26, %v681_v28 }
  0x6b   : > { %749 = vrot.lane.b32.xlu1 %v1903_v63, %s1667_s27  ;;  %747 = vrot.lane.b32.xlu0 %v1604_v8, %s1667_s27  ;;  %v1614_v63 = vld [vmem:[%s1724_s21 + $0x5c] ss:$0 sps:$4 sm:$0x11]   ;;  %v622_v8 = vshll.u32 %v1612_v59, 16 }
  0x6c   : > { %v627_v18 = vshll.u32 %v1614_v63, 16  ;;  %v678_v34 = vrot.slane %v1614_v63, 1 }
  0x6d   : > { %v624_v17 = vrot.slane %v622_v8, 1 }
  0x6e   : > { %v629_v23 = vrot.slane %v627_v18, 1  ;;  %v679_v40 = vsel %vm426_vm0, %v677_v33, %v678_v34 }
  0x6f   : > { %885 = vrot.lane.b32.xlu1 %v850_v41, %s1668_s28  ;;  %883 = vrot.lane.b32.xlu0 %v838_v47, %s1668_s28  ;;  %v625_v22 = vor.u32 %v624_v17, %v620_v16  ;;  %v852_v41 = vshrl.u32 %v1616_v24, 16  ;;  %v873_v47 = vrot.slane %v871_v39, 1 }
  0x71   : > { %v630_v32 = vsel %vm313_vm1, %v625_v22, %v629_v23  ;;  %v857_v48 = vor.u32 %v856_v42, %v852_v41  ;;  %v874_v51 = vsel %vm313_vm1, %v869_v46, %v873_v47 }
  0x73   : > { %422 = vrot.lane.b32.xlu1 %v397_v50, %s1665_s25  ;;  %923 = vrot.lane.b32.xlu0 %v905_v54, %s1669_s29  ;;  %v862_v56 = vsel %vm313_vm1, %v857_v48, %v861_v49 }
  0x77   : > { %424 = vrot.lane.b32.xlu1 %v409_v60, %s1665_s25  ;;  %925 = vrot.lane.b32.xlu0 %v908_v4, %s1669_s29 }
  0x7b   : > { %465 = vrot.lane.b32.xlu1 %v450_v10, %s1664_s24  ;;  %463 = vrot.lane.b32.xlu0 %v447_v15, %s1664_s24 }
  0x7f   : > { %521 = vrot.lane.b32.xlu1 %v1611_v53, %s1662_s22  ;;  %519 = vrot.lane.b32.xlu0 %v1612_v59, %s1662_s22  ;;  %v913_v53 = vrot.slane %v1617_v29, 1  ;;  %v910_v59 = vrot.slane %v1618_v35, 1 }
  0x81   : > { %v914_v60 = vsel %vm426_vm0, %v912_v52, %v913_v53  ;;  %v911_v62 = vsel %vm426_vm0, %v909_v58, %v910_v59 }
  0x83   : > { %657 = vrot.lane.b32.xlu1 %v642_v25, %s1666_s26  ;;  %655 = vrot.lane.b32.xlu0 %v630_v32, %s1666_s26 }
  0x87   : > { %697 = vrot.lane.b32.xlu1 %v682_v36, %s1663_s23  ;;  %695 = vrot.lane.b32.xlu0 %v679_v40, %s1663_s23 }
  0x88   : > { %v510_v44 = vpop.permute.xlu1 %509  ;;  %v508_v45 = vpop.permute.xlu0 %507 }
  0x8b   : > { %753 = vrot.lane.b32.xlu1 %v1615_v21, %s1667_s27  ;;  %751 = vrot.lane.b32.xlu0 %v1616_v24, %s1667_s27 }
  0x8c   : > { %v684_v50 = vpop.permute.xlu0 %683 }
  0x8d   : > { %v452_v54 = vpop.permute.xlu1 %451 }
  0x8f   : > { %889 = vrot.lane.b32.xlu1 %v874_v51, %s1668_s28  ;;  %887 = vrot.lane.b32.xlu0 %v862_v56, %s1668_s28 }
  0x91   : > { %v454_v61 = vpop.permute.xlu1 %453  ;;  %v411_v1 = vpop.permute.xlu0 %410 }
  0x92   : > { %v933_v7 = vsel %vm931_vm3, %v1731_v3, %v411_v1 }
  0x93   : > { %929 = vrot.lane.b32.xlu1 %v914_v60, %s1669_s29  ;;  %927 = vrot.lane.b32.xlu0 %v911_v62, %s1669_s29  ;;  %v950_v10 = vsel %vm948_vm4, %v933_v7, %v452_v54 }
  0x94   : > { %v967_v15 = vsel %vm965_vm5, %v950_v10, %v508_v45 }
  0x95   : > { %v686_v2 = vpop.permute.xlu1 %685  ;;  %v413_v4 = vpop.permute.xlu0 %412 }
  0x96   : > { %v935_v8 = vsel %vm931_vm3, %v1735_v5, %v413_v4 }
  0x97   : > { %v952_v14 = vsel %vm948_vm4, %v935_v8, %v454_v61 }
  0x98   : > { %v969_v3 = vsel %vm965_vm5, %v952_v14, %v510_v44 }
  0x99   : > { %v646_v6 = vpop.permute.xlu1 %645  ;;  %v644_v63 = vpop.permute.xlu0 %643 }
  0x9a   : > { %v984_v16 = vsel %vm982_vm6, %v967_v15, %v644_v63  ;;  %v986_v19 = vsel %vm982_vm6, %v969_v3, %v646_v6 }
  0x9b   : > { %v1001_v5 = vsel %vm999_vm7, %v984_v16, %v684_v50  ;;  %v1003_v25 = vsel %vm999_vm7, %v986_v19, %v686_v2 }
  0x9d   : > { %v742_v11 = vpop.permute.xlu1 %741  ;;  %v740_v13 = vpop.permute.xlu0 %739 }
  0x9e   : > { %v1018_v20 = vsel %vm1016_vm8, %v1001_v5, %v740_v13  ;;  %v1020_v26 = vsel %vm1016_vm8, %v1003_v25, %v742_v11 }
  0xa1   : > { %v878_v17 = vpop.permute.xlu1 %877  ;;  %v876_v18 = vpop.permute.xlu0 %875 }
  0xa2   : > { %v1035_v22 = vsel %vm1033_vm9, %v1018_v20, %v876_v18  ;;  %v1037_v29 = vsel %vm1033_vm9, %v1020_v26, %v878_v17 }
  0xa5   : > { %v415_v21 = vpop.permute.xlu1 %414  ;;  %v916_v23 = vpop.permute.xlu0 %915 }
  0xa6   : > { %v1052_v24 = vsel %vm1050_vm10, %v1035_v22, %v916_v23  ;;  %v937_v42 = vsel %vm931_vm3, %v1772_v55, %v415_v21 }
  0xa7   : > { %1498 = vmatprep.mubr.msk.bf16.mxu0 %vm1087_vm11, %v1052_v24 }
  0xa9   : > { %v417_v28 = vpop.permute.xlu1 %416  ;;  %v918_v31 = vpop.permute.xlu0 %917 }
  0xaa   : > { %v1054_v32 = vsel %vm1050_vm10, %v1037_v29, %v918_v31  ;;  %v939_v48 = vsel %vm931_vm3, %v1783_v0, %v417_v28 }
  0xab   : > { %1499 = vmatmul.mubr.msk.bf16.vlgmr.msra.gmra.mrb[0].mxu0 %vm1087_vm11, %v1054_v32 }
  0xad   : > { %v458_v33 = vpop.permute.xlu1 %457  ;;  %v456_v34 = vpop.permute.xlu0 %455 }
  0xae   : > { %v954_v43 = vsel %vm948_vm4, %v937_v42, %v456_v34  ;;  %v956_v50 = vsel %vm948_vm4, %v939_v48, %v458_v33 }
  0xb1   : > { %v514_v35 = vpop.permute.xlu1 %513  ;;  %v512_v30 = vpop.permute.xlu0 %511 }
  0xb2   : > { %v971_v45 = vsel %vm965_vm5, %v954_v43, %v512_v30  ;;  %v973_v55 = vsel %vm965_vm5, %v956_v50, %v514_v35 }
  0xb5   : > { %v650_v36 = vpop.permute.xlu1 %649  ;;  %v648_v37 = vpop.permute.xlu0 %647 }
  0xb6   : > { %v988_v47 = vsel %vm982_vm6, %v971_v45, %v648_v37  ;;  %v990_v56 = vsel %vm982_vm6, %v973_v55, %v650_v36 }
  0xb9   : > { %v690_v38 = vpop.permute.xlu1 %689  ;;  %v688_v39 = vpop.permute.xlu0 %687 }
  0xba   : > { %v1005_v49 = vsel %vm999_vm7, %v988_v47, %v688_v39  ;;  %v1007_v59 = vsel %vm999_vm7, %v990_v56, %v690_v38 }
  0xbd   : > { %v746_v40 = vpop.permute.xlu1 %745  ;;  %v744_v41 = vpop.permute.xlu0 %743 }
  0xbe   : > { %v1022_v51 = vsel %vm1016_vm8, %v1005_v49, %v744_v41  ;;  %v1024_v0 = vsel %vm1016_vm8, %v1007_v59, %v746_v40 }
  0xc1   : > { %v882_v44 = vpop.permute.xlu1 %881  ;;  %v880_v46 = vpop.permute.xlu0 %879 }
  0xc2   : > { %v1039_v53 = vsel %vm1033_vm9, %v1022_v51, %v880_v46  ;;  %v1041_v61 = vsel %vm1033_vm9, %v1024_v0, %v882_v44 }
  0xc5   : > { %v419_v52 = vpop.permute.xlu1 %418  ;;  %v920_v54 = vpop.permute.xlu0 %919 }
  0xc6   : > { %v1056_v58 = vsel %vm1050_vm10, %v1039_v53, %v920_v54  ;;  %v941_v15 = vsel %vm931_vm3, %v1831_v57, %v419_v52 }
  0xc7   : > { %1502 = vmatprep.mubr.msk.bf16.mxu0 %vm1087_vm11, %v1056_v58 }
  0xc9   : > { %v421_v60 = vpop.permute.xlu1 %420  ;;  %v922_v62 = vpop.permute.xlu0 %921 }
  0xca   : > { %v1058_v1 = vsel %vm1050_vm10, %v1041_v61, %v922_v62  ;;  %v943_v19 = vsel %vm931_vm3, %v1848_v9, %v421_v60 }
  0xcb   : > { %1503 = vmatmul.mubr.msk.bf16.gmra.mrb[4].mxu0 %vm1087_vm11, %v1058_v1 }
  0xcd   : > { %v462_v2 = vpop.permute.xlu1 %461  ;;  %v460_v4 = vpop.permute.xlu0 %459 }
  0xce   : > { %v958_v16 = vsel %vm948_vm4, %v941_v15, %v460_v4  ;;  %v960_v21 = vsel %vm948_vm4, %v943_v19, %v462_v2 }
  0xd1   : > { %v518_v6 = vpop.permute.xlu1 %517  ;;  %v516_v7 = vpop.permute.xlu0 %515 }
  0xd2   : > { %v975_v3 = vsel %vm965_vm5, %v958_v16, %v516_v7  ;;  %v977_v57 = vsel %vm965_vm5, %v960_v21, %v518_v6 }
  0xd5   : > { %v654_v63 = vpop.permute.xlu1 %653  ;;  %v652_v8 = vpop.permute.xlu0 %651 }
  0xd6   : > { %v992_v5 = vsel %vm982_vm6, %v975_v3, %v652_v8  ;;  %v994_v26 = vsel %vm982_vm6, %v977_v57, %v654_v63 }
  0xd9   : > { %v694_v10 = vpop.permute.xlu1 %693  ;;  %v692_v11 = vpop.permute.xlu0 %691 }
  0xda   : > { %v1009_v20 = vsel %vm999_vm7, %v992_v5, %v692_v11  ;;  %v1011_v29 = vsel %vm999_vm7, %v994_v26, %v694_v10 }
  0xdd   : > { %v750_v13 = vpop.permute.xlu1 %749  ;;  %v748_v14 = vpop.permute.xlu0 %747 }
  0xde   : > { %v1026_v22 = vsel %vm1016_vm8, %v1009_v20, %v748_v14  ;;  %v1028_v9 = vsel %vm1016_vm8, %v1011_v29, %v750_v13 }
  0xe1   : > { %v886_v17 = vpop.permute.xlu1 %885  ;;  %v884_v18 = vpop.permute.xlu0 %883 }
  0xe2   : > { %v1043_v24 = vsel %vm1033_vm9, %v1026_v22, %v884_v18  ;;  %v1045_v32 = vsel %vm1033_vm9, %v1028_v9, %v886_v17 }
  0xe5   : > { %v423_v23 = vpop.permute.xlu1 %422  ;;  %v924_v25 = vpop.permute.xlu0 %923 }
  0xe6   : > { %v1060_v28 = vsel %vm1050_vm10, %v1043_v24, %v924_v25  ;;  %v945_v45 = vsel %vm931_vm3, %v1914_v12, %v423_v23 }
  0xe7   : > { %1506 = vmatprep.mubr.msk.bf16.mxu1 %vm1087_vm11, %v1060_v28 }
  0xe9   : > { %v425_v31 = vpop.permute.xlu1 %424  ;;  %v926_v33 = vpop.permute.xlu0 %925 }
  0xea   : > { %v1062_v34 = vsel %vm1050_vm10, %v1045_v32, %v926_v33  ;;  %v947_v44 = vsel %vm931_vm3, %v1931_v27, %v425_v31 }
  0xeb   : > { %1507 = vmatmul.mubr.msk.bf16.vlgmr.msra.gmra.mrb[0].mxu1 %vm1087_vm11, %v1062_v34 }
  0xed   : > { %v466_v35 = vpop.permute.xlu1 %465  ;;  %v464_v30 = vpop.permute.xlu0 %463 }
  0xee   : > { %v964_v46 = vsel %vm948_vm4, %v947_v44, %v466_v35  ;;  %v962_v47 = vsel %vm948_vm4, %v945_v45, %v464_v30 }
  0xf1   : > { %v522_v36 = vpop.permute.xlu1 %521  ;;  %v520_v37 = vpop.permute.xlu0 %519 }
  0xf2   : > { %v981_v48 = vsel %vm965_vm5, %v964_v46, %v522_v36  ;;  %v979_v50 = vsel %vm965_vm5, %v962_v47, %v520_v37 }
  0xf5   : > { %v658_v38 = vpop.permute.xlu1 %657  ;;  %v656_v39 = vpop.permute.xlu0 %655 }
  0xf6   : > { %v998_v51 = vsel %vm982_vm6, %v981_v48, %v658_v38  ;;  %v996_v55 = vsel %vm982_vm6, %v979_v50, %v656_v39 }
  0xf9   : > { %v698_v40 = vpop.permute.xlu1 %697  ;;  %v696_v41 = vpop.permute.xlu0 %695 }
  0xfa   : > { %v1015_v53 = vsel %vm999_vm7, %v998_v51, %v698_v40  ;;  %v1013_v27 = vsel %vm999_vm7, %v996_v55, %v696_v41 }
  0xfd   : > { %v754_v42 = vpop.permute.xlu1 %753  ;;  %v752_v43 = vpop.permute.xlu0 %751 }
  0xfe   : > { %v1032_v12 = vsel %vm1016_vm8, %v1015_v53, %v754_v42  ;;  %v1030_v54 = vsel %vm1016_vm8, %v1013_v27, %v752_v43 }
 0x101   : > { %v890_v49 = vpop.permute.xlu1 %889  ;;  %v888_v52 = vpop.permute.xlu0 %887 }
 0x102   : > { %v1049_v56 = vsel %vm1033_vm9, %v1032_v12, %v890_v49  ;;  %v1047_v59 = vsel %vm1033_vm9, %v1030_v54, %v888_v52 }
 0x105   : > { %v930_v58 = vpop.permute.xlu1 %929  ;;  %v928_v60 = vpop.permute.xlu0 %927 }
 0x106   : > { %v1066_v0 = vsel %vm1050_vm10, %v1049_v56, %v930_v58  ;;  %v1064_v61 = vsel %vm1050_vm10, %v1047_v59, %v928_v60 }
 0x107   : > { %1510 = vmatprep.mubr.msk.bf16.mxu1 %vm1087_vm11, %v1064_v61 }
 0x108   : > { %1511 = vmatmul.mubr.msk.bf16.gmra.mrb[4].mxu1 %vm1087_vm11, %v1066_v0 }
 0x17e   : > { %v1500_v62 = vpop.f32.mrb[0].mxu0 }
 0x17f   : > { %v1142_v1 = vpop.f32.mrb[1].mxu0  ;;  %v1228_v8 = vmul.f32 %v1500_v62, %v1500_v62 }
 0x180   : > { %v1501_v2 = vpop.f32.mrb[2].mxu0  ;;  %v1226_v6 = vmul.f32 %v1142_v1, %v1142_v1 }
 0x181   : > { %v1145_v4 = vpop.f32.mrb[3].mxu0  ;;  %v1229_v13 = vmul.f32 %v1501_v2, %v1501_v2 }
 0x182   : > { %v1205_v7 = vadd.f32 %v1145_v4, %v1142_v1  ;;  %v1227_v63 = vmul.f32 %v1145_v4, %v1145_v4 }
 0x184   : > { %v1206_v10 = vadd.f32 %v1500_v62, %v1205_v7  ;;  %v1242_v11 = vadd.f32 %v1227_v63, %v1226_v6 }
 0x186   : > { %v1243_v14 = vadd.f32 %v1242_v11, %v1228_v8  ;;  %v1207_v15 = vadd.f32 %v1501_v2, %v1206_v10 }
 0x188   : > { %v1244_v16 = vadd.f32 %v1243_v14, %v1229_v13 }
 0x19e   : > { %v1504_v17 = vpop.f32.mrb[4].mxu0 }
 0x19f   : > { %v1158_v3 = vpop.f32.mrb[5].mxu0  ;;  %v1232_v57 = vmul.f32 %v1504_v17, %v1504_v17 }
 0x1a0   : > { %v1208_v18 = vadd.f32 %v1207_v15, %v1158_v3  ;;  %v1230_v5 = vmul.f32 %v1158_v3, %v1158_v3  ;;  %v1505_v19 = vpop.f32.mrb[6].mxu0 }
 0x1a1   : > { %v1161_v20 = vpop.f32.mrb[7].mxu0  ;;  %v1233_v26 = vmul.f32 %v1505_v19, %v1505_v19 }
 0x1a2   : > { %v1245_v21 = vadd.f32 %v1244_v16, %v1230_v5  ;;  %v1209_v22 = vadd.f32 %v1208_v18, %v1161_v20  ;;  %v1231_v23 = vmul.f32 %v1161_v20, %v1161_v20 }
 0x1a4   : > { %v1210_v24 = vadd.f32 %v1504_v17, %v1209_v22  ;;  %v1246_v25 = vadd.f32 %v1245_v21, %v1231_v23 }
 0x1a6   : > { %v1247_v28 = vadd.f32 %v1246_v25, %v1232_v57  ;;  %v1211_v29 = vadd.f32 %v1505_v19, %v1210_v24 }
 0x1a8   : > { %v1248_v9 = vadd.f32 %v1247_v28, %v1233_v26 }
 0x1be   : > { %v1508_v31 = vpop.f32.mrb[0].mxu1 }
 0x1bf   : > { %v1174_v32 = vpop.f32.mrb[1].mxu1  ;;  %v1236_v39 = vmul.f32 %v1508_v31, %v1508_v31 }
 0x1c0   : > { %v1212_v33 = vadd.f32 %v1211_v29, %v1174_v32  ;;  %v1234_v34 = vmul.f32 %v1174_v32, %v1174_v32  ;;  %v1509_v35 = vpop.f32.mrb[2].mxu1 }
 0x1c1   : > { %v1177_v30 = vpop.f32.mrb[3].mxu1  ;;  %v1237_v42 = vmul.f32 %v1509_v35, %v1509_v35 }
 0x1c2   : > { %v1249_v36 = vadd.f32 %v1248_v9, %v1234_v34  ;;  %v1213_v37 = vadd.f32 %v1212_v33, %v1177_v30  ;;  %v1235_v38 = vmul.f32 %v1177_v30, %v1177_v30 }
 0x1c4   : > { %v1214_v40 = vadd.f32 %v1508_v31, %v1213_v37  ;;  %v1250_v41 = vadd.f32 %v1249_v36, %v1235_v38 }
 0x1c6   : > { %v1251_v43 = vadd.f32 %v1250_v41, %v1236_v39  ;;  %v1215_v44 = vadd.f32 %v1509_v35, %v1214_v40 }
 0x1c8   : > { %v1252_v45 = vadd.f32 %v1251_v43, %v1237_v42 }
 0x1db   : > { %v1512_v46 = vpop.f32.mrb[4].mxu1 }
 0x1dc   : > { %v1190_v47 = vpop.f32.mrb[5].mxu1  ;;  %v1240_v27 = vmul.f32 %v1512_v46, %v1512_v46 }
 0x1dd   : > { %v1216_v48 = vadd.f32 %v1215_v44, %v1190_v47  ;;  %v1238_v49 = vmul.f32 %v1190_v47, %v1190_v47  ;;  %v1513_v50 = vpop.f32.mrb[6].mxu1 }
 0x1de   : > { %v1193_v51 = vpop.f32.mrb[7].mxu1  ;;  %v1241_v56 = vmul.f32 %v1513_v50, %v1513_v50 }
 0x1df   : > { %v1253_v52 = vadd.f32 %v1252_v45, %v1238_v49  ;;  %v1217_v55 = vadd.f32 %v1216_v48, %v1193_v51  ;;  %v1239_v53 = vmul.f32 %v1193_v51, %v1193_v51 }
 0x1e1   : > { %v1218_v12 = vadd.f32 %v1512_v46, %v1217_v55  ;;  %v1254_v54 = vadd.f32 %v1253_v52, %v1239_v53 }
 0x1e3   : > { %v1219_v58 = vadd.f32 %v1513_v50, %v1218_v12  ;;  %v1255_v59 = vadd.f32 %v1254_v54, %v1240_v27 }
 0x1e5   : > { %v1220_v0 = vrot.slane %v1219_v58, 4  ;;  %v1256_v60 = vadd.f32 %v1255_v59, %v1241_v56 }
 0x1e7   : > { %v1221_v61 = vadd.f32 %v1220_v0, %v1219_v58  ;;  %v1257_v62 = vrot.slane %v1256_v60, 4 }
 0x1e9   : > { %v1222_v1 = vrot.slane %v1221_v61, 2  ;;  %v1258_v2 = vadd.f32 %v1257_v62, %v1256_v60 }
 0x1eb   : > { %v1223_v4 = vadd.f32 %v1222_v1, %v1221_v61  ;;  %v1259_v6 = vrot.slane %v1258_v2, 2 }
 0x1ed   : > { %v1224_v7 = vrot.slane %v1223_v4, 1  ;;  %v1260_v63 = vadd.f32 %v1259_v6, %v1258_v2 }
 0x1ef   : > { %v1261_v8 = vrot.slane %v1260_v63, 1  ;;  %v1225_v10 = vadd.f32 %v1224_v7, %v1223_v4 }
 0x1f1   : > { %v1262_v11 = vadd.f32 %v1261_v8, %v1260_v63 }
 0x1f3   : > { %v1264_v13 = vsel %vm1263_vm12, %v1225_v10, %v1262_v11 }
 0x1f4   : > { %1265 = vst [vmem:[%s163_s20] sm:$0x3] %v1264_v13 }
 0x1f5 PF: > { %s12_s13 = sadd.s32 1, %s1660_s13   ;;  %s2095_s9 = smov %s1652_s11 }
 0x1f6   : > { %p9_p7 = scmp.ge.s32.totalorder %s12_s13, 6   ;;  %s2096_s10 = smov %s1656_s12 }
 0x1f7   : > { %s2097_s11 = smov %s2100_s14  ;;  %s2098_s12 = smov %s2104_s15 }
 0x1f8   :  { %11 = sbr.rel (!%p9_p7) target bundleno = 3 (0x3), region = 61 }

// kernel: _conv_bn_relu_impl.3
= control target key start
LH: loop header
LB: loop body
LE: loop exit
PB: predicated region body
PF: predicated region fallthrough
CT: control target
= control target key end

     0   :  { %s1776_s15 = smov 0   ;;  %s1778_s16 = smov 0   ;;  %s2286_s0 = inlined_call_operand.vmem [shape: bf16[2,18,18,4], index: 0, kind: input, shape index: {}]   ;;  %s2287_s1 = inlined_call_operand.vmem [shape: bf16[36,128], index: 1, kind: input, shape index: {}]   ;;  %s2288_s2 = inlined_call_operand.vmem [shape: f32[1,128], index: 2, kind: input, shape index: {}]   ;;  %s2289_s3 = inlined_call_operand.vmem [shape: f32[1,128], index: 3, kind: input, shape index: {}]   ;;  %s2290_s4 = inlined_call_operand.vmem [shape: f32[2,256,128], index: 4, kind: output, shape index: {}]  }
   0x1   :  { %s1780_s17 = smov 0   ;;  %s1782_s18 = smov 0  }
   0x2   :  { %s1784_s19 = smov 0  }
   0x3 LB: > { %s23_s20 = sadd.s32 1, %s1733_s17  ;;  %s26_s21 = sadd.s32 1, %s1737_s18  ;;  %s1741_s19 = sphi %s1784_s19, %s14_s19   ;;  %s1737_s18 = sphi %s1782_s18, %s2294_s18   ;;  %s1733_s17 = sphi %s1780_s17, %s2293_s17   ;;  %s1729_s16 = sphi %s1778_s16, %s2292_s16   ;;  %s1725_s15 = sphi %s1776_s15, %s2291_s15  }
   0x4   : > { %p24_p0 = scmp.ge.s32.totalorder %s23_s20, 2  ;;  %p1438_p1 = scmp.ge.s32.totalorder %s1741_s19, 1 }
   0x5   : > { %p176_p2 = scmp.lt.s32.totalorder %s1741_s19, 5 }
   0x6   : > { %s2296_s20 = smov (%p24_p0, %s23_s20), 0  ;;  %s2298_s21 = smov (!%p24_p0, %s26_s21), %s1737_s18 }
   0x7   : > { %p177_p3 = pnand %p1438_p1, %p176_p2  ;;  %p28_p4 = scmp.ge.s32.totalorder %s2298_s21, 2 }
   0x8   : > { %p206_p5 = scmp.lt.s32.totalorder (!%p177_p3), %s1729_s16, 1  ;;  %s1561_s22 = smul.u32 (!%p177_p3), 96, %s1725_s15  ;;  %vm483_vm0 = vcmask (!%p177_p3), 1046528   ;;  %vm370_vm1 = vsmask.f32 (!%p177_p3), 7424  ;;  %vm1161_vm2 = vcmask (!%p177_p3), 1041408  }
   0x9   : > { %s2300_s21 = smov (%p28_p4, %s2298_s21), 0  ;;  %180 = sbr.rel (%p177_p3) target bundleno = 485 (0x1e5), region = 36 }
   0xa   : > { %s1743_s28 = smov (!%p177_p3), 12   ;;  %s1744_s29 = smov (!%p177_p3), 8   ;;  %vm988_vm3 = vcmask (!%p177_p3), 31744   ;;  %vm1005_vm4 = vcmask (!%p177_p3), 64512   ;;  %vm1022_vm5 = vcmask (!%p177_p3), 97280   ;;  %vm1039_vm6 = vcmask (!%p177_p3), 130048  }
   0xb   : > { %s1745_s30 = smov (!%p177_p3), 4   ;;  %s1746_s5 = smov (!%p177_p3), 16   ;;  %vm1056_vm7 = vcmask (!%p177_p3), 162816   ;;  %vm1073_vm8 = vcmask (!%p177_p3), 195584   ;;  %vm1090_vm9 = vcmask (!%p177_p3), 228352   ;;  %vm1107_vm10 = vcmask (!%p177_p3), 261120  }
   0xc   : > { %s1747_s6 = smov (!%p177_p3), 20   ;;  %s1748_s7 = smov (!%p177_p3), 24   ;;  %vm1144_vm11 = vcmask (!%p177_p3), 293888  }
   0xd   : > { %s1749_s8 = smov (!%p177_p3), 28   ;;  %s1750_s13 = smov (!%p177_p3), 32  }
  0x10   : > { %s2302_s16 = smov (!%p206_p5, %s1729_s16), 1 }
  0x11   : > { %s1603_s23 = smul.u32 216, %s2302_s16  ;;  %s1441_s24 = sshll.u32 %s2302_s16, 5 }
  0x13   : > { %s210_s26 = scalar_lea.vmem %s2286_s0, %s1603_s23  ;;  %s1440_s23 = sshll.u32 %s1725_s15, 4 }
  0x14   : > { %s1815_s27 = scalar_lea.vmem %s210_s26, %s1561_s22  ;;  %p214_p6 = scmp.lt.s32.totalorder %s1440_s23, 31 }
  0x15   : > { %v1818_v0 = vld [vmem:[%s1815_s27 + $0x3c] sm:$0xff]   ;;  %v1821_v1 = vld [vmem:[%s1815_s27 + $0xc] sm:$0xff]   ;;  %v1655_v3 = vld [vmem:[%s1815_s27 + $0x38] ss:$0 sps:$4 sm:$0x11]  }
  0x16   : > { %572 = vrot.lane.b32.xlu1 %v1818_v0, %s1743_s28  ;;  %564 = vrot.lane.b32.xlu0 %v1821_v1, %s1743_s28  ;;  %v1828_v2 = vld [vmem:[%s1815_s27 + $0x30] sm:$0xff]   ;;  %v1832_v4 = vld [vmem:[%s1815_s27] sm:$0xff]   ;;  %v653_v5 = vshrl.u32 %v1818_v0, 16  ;;  %v497_v7 = vrot.slane %v1655_v3, 1  ;;  %v427_v43 = vshll.u32 %v1655_v3, 16  ;;  %v655_v48 = vshll.u32 %v1818_v0, 16 }
  0x17   : > { %v496_v6 = vrot.slane %v1828_v2, 1  ;;  %v1657_v8 = vld [vmem:[%s1815_s27 + $0x8] ss:$0 sps:$4 sm:$0x11]   ;;  %v1838_v9 = vld [vmem:[%s1815_s27 + $0x3c] sm:$0xff]   ;;  %v484_v10 = vrot.slane %v1832_v4, 1 }
  0x18   : > { %v1842_v11 = vld [vmem:[%s1815_s27 + $0xc] sm:$0xff]   ;;  %v485_v13 = vrot.slane %v1657_v8, 1  ;;  %v1659_v14 = vld [vmem:[%s1815_s27 + $0x44] ss:$0 sps:$4 sm:$0x11]   ;;  %v499_v15 = vrot.slane %v1838_v9, 1 }
  0x19   : > { %v498_v12 = vsel %vm483_vm0, %v496_v6, %v497_v7  ;;  %v487_v16 = vrot.slane %v1842_v11, 1  ;;  %v500_v18 = vrot.slane %v1659_v14, 1  ;;  %v1661_v19 = vld [vmem:[%s1815_s27 + $0x14] ss:$0 sps:$4 sm:$0x11]   ;;  %v384_v20 = vshrl.u32 %v1842_v11, 16 }
  0x1a   : > { %516 = vrot.lane.b32.xlu1 %v498_v12, %s1744_s29  ;;  %v486_v17 = vsel %vm483_vm0, %v484_v10, %v485_v13  ;;  %v386_v21 = vshll.u32 %v1842_v11, 16  ;;  %v372_v22 = vshrl.u32 %v1832_v4, 16  ;;  %v374_v23 = vshll.u32 %v1832_v4, 16  ;;  %v1862_v36 = vld [vmem:[%s1815_s27 + $0x48] sm:$0xff]   ;;  %v1874_v52 = vld [vmem:[%s1815_s27 + $0x18] sm:$0xff]   ;;  %s2304_s23 = smov (!%p214_p6, %s1440_s23), 31 }
  0x1b   : > { %508 = vrot.lane.b32.xlu0 %v486_v17, %s1744_s29  ;;  %v501_v24 = vsel %vm483_vm0, %v499_v15, %v500_v18  ;;  %v488_v25 = vrot.slane %v1661_v19, 1  ;;  %v391_v26 = vshll.u32 %v1661_v19, 16  ;;  %v379_v27 = vshll.u32 %v1657_v8, 16  ;;  %v1664_v44 = vld [vmem:[%s1815_s27 + $0x44] ss:$0 sps:$4 sm:$0x11]   ;;  %s217_s25 = sadd.s32 %s1441_s24, %s2304_s23 }
  0x1c   : > { %v388_v28 = vrot.slane %v386_v21, 1  ;;  %v376_v29 = vrot.slane %v374_v23, 1  ;;  %v432_v30 = vshrl.u32 %v1838_v9, 16  ;;  %v434_v31 = vshll.u32 %v1838_v9, 16 }
  0x1d   : > { %v489_v32 = vsel %vm483_vm0, %v487_v16, %v488_v25  ;;  %v393_v33 = vrot.slane %v391_v26, 1  ;;  %v381_v34 = vrot.slane %v379_v27, 1  ;;  %v439_v35 = vshll.u32 %v1659_v14, 16  ;;  %v1665_v49 = vld [vmem:[%s1815_s27 + $0x14] ss:$0 sps:$4 sm:$0x11]  }
  0x1e   : > { %518 = vrot.lane.b32.xlu1 %v501_v24, %s1744_s29  ;;  %v389_v37 = vor.u32 %v388_v28, %v384_v20  ;;  %v377_v38 = vor.u32 %v376_v29, %v372_v22  ;;  %v436_v39 = vrot.slane %v434_v31, 1  ;;  %v420_v40 = vshrl.u32 %v1828_v2, 16  ;;  %v1666_v58 = vld [vmem:[%s1815_s27 + $0x50] ss:$0 sps:$4 sm:$0x11]  }
  0x1f   : > { %510 = vrot.lane.b32.xlu0 %v489_v32, %s1744_s29  ;;  %v441_v41 = vrot.slane %v439_v35, 1  ;;  %v422_v42 = vshll.u32 %v1828_v2, 16  ;;  %v429_v51 = vrot.slane %v427_v43, 1  ;;  %v660_v53 = vshll.u32 %v1664_v44, 16 }
  0x20   : > { %v394_v45 = vsel %vm370_vm1, %v389_v37, %v393_v33  ;;  %v382_v46 = vsel %vm370_vm1, %v377_v38, %v381_v34  ;;  %v437_v47 = vor.u32 %v436_v39, %v432_v30  ;;  %v657_v55 = vrot.slane %v655_v48, 1  ;;  %v1667_v62 = vld [vmem:[%s1815_s27 + $0x20] ss:$0 sps:$4 sm:$0x11]   ;;  %v1904_v30 = vld [vmem:[%s1815_s27 + $0x48] sm:$0xff]   ;;  %v1919_v38 = vld [vmem:[%s1815_s27 + $0x54] sm:$0xff]  }
  0x21   : > { %v424_v50 = vrot.slane %v422_v42, 1  ;;  %v607_v56 = vshll.u32 %v1821_v1, 16  ;;  %v612_v57 = vshll.u32 %v1665_v49, 16  ;;  %v605_v60 = vshrl.u32 %v1821_v1, 16 }
  0x22   : > { %469 = vrot.lane.b32.xlu1 %v394_v45, %s1745_s30  ;;  %v442_v54 = vsel %vm370_vm1, %v437_v47, %v441_v41  ;;  %v667_v61 = vshll.u32 %v1862_v36, 16  ;;  %v662_v63 = vrot.slane %v660_v53, 1  ;;  %v665_v8 = vshrl.u32 %v1862_v36, 16  ;;  %v1916_v37 = vld [vmem:[%s1815_s27 + $0x50] ss:$0 sps:$4 sm:$0x11]  }
  0x23   : > { %467 = vrot.lane.b32.xlu0 %v382_v46, %s1745_s30  ;;  %v425_v59 = vor.u32 %v424_v50, %v420_v40  ;;  %v609_v3 = vrot.slane %v607_v56, 1  ;;  %v614_v7 = vrot.slane %v612_v57, 1  ;;  %v619_v10 = vshll.u32 %v1874_v52, 16  ;;  %v1924_v40 = vld [vmem:[%s1815_s27 + $0x24] sm:$0xff]  }
  0x24   : > { %v658_v12 = vor.u32 %v657_v55, %v653_v5  ;;  %v669_v13 = vrot.slane %v667_v61, 1  ;;  %v672_v14 = vshll.u32 %v1666_v58, 16  ;;  %v617_v16 = vshrl.u32 %v1874_v52, 16  ;;  %v1938_v48 = vld [vmem:[%s1815_s27 + $0x5c] ss:$0 sps:$4 sm:$0x11]  }
  0x25   : > { %v430_v6 = vsel %vm370_vm1, %v425_v59, %v429_v51  ;;  %v610_v15 = vor.u32 %v609_v3, %v605_v60  ;;  %v621_v17 = vrot.slane %v619_v10, 1  ;;  %v624_v18 = vshll.u32 %v1667_v62, 16  ;;  %v1945_v53 = vld [vmem:[%s1815_s27 + $0x2c] ss:$0 sps:$4 sm:$0x11]   ;;  %v1955_v59 = vld [vmem:[%s1815_s27 + $0x18] sm:$0xff]  }
  0x26   : > { %477 = vrot.lane.b32.xlu1 %v442_v54, %s1745_s30  ;;  %v663_v19 = vsel %vm370_vm1, %v658_v12, %v662_v63  ;;  %v670_v20 = vor.u32 %v669_v13, %v665_v8  ;;  %v674_v21 = vrot.slane %v672_v14, 1  ;;  %v728_v25 = vrot.slane %v1818_v0, 1  ;;  %v1948_v54 = vld [vmem:[%s1815_s27 + $0x48] sm:$0xff]  }
  0x27   : > { %475 = vrot.lane.b32.xlu0 %v430_v6, %s1745_s30  ;;  %v615_v5 = vsel %vm370_vm1, %v610_v15, %v614_v7  ;;  %v622_v22 = vor.u32 %v621_v17, %v617_v16  ;;  %v626_v23 = vrot.slane %v624_v18, 1  ;;  %v729_v26 = vrot.slane %v1664_v44, 1  ;;  %v1962_v7 = vld [vmem:[%s1815_s27 + $0x50] ss:$0 sps:$4 sm:$0x11]  }
  0x28   : > { %v675_v24 = vsel %vm370_vm1, %v670_v20, %v674_v21  ;;  %v716_v28 = vrot.slane %v1821_v1, 1  ;;  %v717_v29 = vrot.slane %v1665_v49, 1  ;;  %v731_v32 = vrot.slane %v1862_v36, 1  ;;  %v1913_v1 = vld [vmem:[%s1815_s27 + $0x18] sm:$0xff]  }
  0x29   : > { %v627_v27 = vsel %vm370_vm1, %v622_v22, %v626_v23  ;;  %v730_v31 = vsel %vm483_vm0, %v728_v25, %v729_v26  ;;  %v732_v0 = vrot.slane %v1666_v58, 1  ;;  %v719_v34 = vrot.slane %v1874_v52, 1  ;;  %v1972_v17 = vld [vmem:[%s1815_s27 + $0x20] ss:$0 sps:$4 sm:$0x11]   ;;  %v1981_v22 = vld [vmem:[%s1815_s27 + $0x54] sm:$0xff]  }
  0x2a   : > { %574 = vrot.lane.b32.xlu1 %v1862_v36, %s1743_s28  ;;  %v718_v33 = vsel %vm483_vm0, %v716_v28, %v717_v29  ;;  %v720_v35 = vrot.slane %v1667_v62, 1  ;;  %v887_v39 = vshll.u32 %v1904_v30, 16  ;;  %v1927_v36 = vld [vmem:[%s1815_s27 + $0x20] ss:$0 sps:$4 sm:$0x11]   ;;  %v839_v43 = vshll.u32 %v1913_v1, 16 }
  0x2b   : > { %566 = vrot.lane.b32.xlu0 %v1874_v52, %s1743_s28  ;;  %v733_v41 = vsel %vm483_vm0, %v731_v32, %v732_v0  ;;  %v885_v44 = vshrl.u32 %v1904_v30, 16  ;;  %v892_v46 = vshll.u32 %v1916_v37, 16  ;;  %v844_v47 = vshll.u32 %v1927_v36, 16  ;;  %v1994_v32 = vld [vmem:[%s1815_s27 + $0x5c] ss:$0 sps:$4 sm:$0x11]  }
  0x2c   : > { %v721_v42 = vsel %vm483_vm0, %v719_v34, %v720_v35  ;;  %v889_v45 = vrot.slane %v887_v39, 1  ;;  %v899_v49 = vshll.u32 %v1919_v38, 16  ;;  %v851_v50 = vshll.u32 %v1924_v40, 16 }
  0x2d   : > { %v837_v51 = vshrl.u32 %v1913_v1, 16  ;;  %v841_v52 = vrot.slane %v839_v43, 1  ;;  %v894_v56 = vrot.slane %v892_v46, 1  ;;  %v897_v57 = vshrl.u32 %v1919_v38, 16  ;;  %v1701_v43 = vld [vmem:[%s2287_s1 + $0x8] sm:$0xff]  }
  0x2e   : > { %708 = vrot.lane.b32.xlu1 %v663_v19, %s1746_s5  ;;  %v890_v55 = vor.u32 %v889_v45, %v885_v44  ;;  %v849_v58 = vshrl.u32 %v1924_v40, 16  ;;  %v846_v60 = vrot.slane %v844_v47, 1  ;;  %v901_v61 = vrot.slane %v899_v49, 1 }
  0x2f   : > { %700 = vrot.lane.b32.xlu0 %v615_v5, %s1746_s5  ;;  %v904_v62 = vshll.u32 %v1938_v48, 16  ;;  %v853_v63 = vrot.slane %v851_v50, 1  ;;  %v842_v3 = vor.u32 %v841_v52, %v837_v51  ;;  %v856_v6 = vshll.u32 %v1945_v53, 16 }
  0x30   : > { %v895_v8 = vsel %vm370_vm1, %v890_v55, %v894_v56  ;;  %v902_v10 = vor.u32 %v901_v61, %v897_v57  ;;  %v446_v13 = vshll.u32 %v1948_v54, 16  ;;  %v398_v18 = vshll.u32 %v1955_v59, 16 }
  0x31   : > { %v906_v12 = vrot.slane %v904_v62, 1  ;;  %v847_v14 = vsel %vm370_vm1, %v842_v3, %v846_v60  ;;  %v854_v15 = vor.u32 %v853_v63, %v849_v58  ;;  %v858_v16 = vrot.slane %v856_v6, 1 }
  0x32   : > { %710 = vrot.lane.b32.xlu1 %v675_v24, %s1746_s5  ;;  %v960_v19 = vrot.slane %v1904_v30, 1  ;;  %v961_v20 = vrot.slane %v1916_v37, 1  ;;  %v948_v21 = vrot.slane %v1913_v1, 1  ;;  %v451_v5 = vshll.u32 %v1962_v7, 16  ;;  %v1700_v37 = vld [vmem:[%s2287_s1] sm:$0xff]  }
  0x33   : > { %702 = vrot.lane.b32.xlu0 %v627_v27, %s1746_s5  ;;  %v907_v23 = vsel %vm370_vm1, %v902_v10, %v906_v12  ;;  %v949_v24 = vrot.slane %v1927_v36, 1  ;;  %v444_v25 = vshrl.u32 %v1948_v54, 16  ;;  %v448_v26 = vrot.slane %v446_v13, 1  ;;  %1573 = vmatprep.subr.bf16.mxu0 %v1700_v37  ;;  %v1702_v12 = vld [vmem:[%s2287_s1 + $0x10] ss:$0 sps:$4 sm:$0x33]  }
  0x34   : > { %v859_v27 = vsel %vm370_vm1, %v854_v15, %v858_v16  ;;  %v396_v28 = vshrl.u32 %v1955_v59, 16  ;;  %v400_v29 = vrot.slane %v398_v18, 1  ;;  %v453_v0 = vrot.slane %v451_v5, 1  ;;  %1595 = vmatprep.subr.bf16.mxu1 %v1700_v37  ;;  %1574 = vmatpush3.bf16.msra.mxu0 %v1700_v37  ;;  %v2044_v15 = vld [vmem:[%s1815_s27 + $0x54] sm:$0xff]   ;;  %v1686_v5 = vld [vmem:[%s1815_s27 + $0x60] sm:$0xff]  }
  0x35   : > { %v962_v34 = vsel %vm483_vm0, %v960_v19, %v961_v20  ;;  %v449_v35 = vor.u32 %v448_v26, %v444_v25  ;;  %v950_v39 = vsel %vm483_vm0, %v948_v21, %v949_v24  ;;  %v963_v44 = vrot.slane %v1919_v38, 1  ;;  %1598 = vmatpush3.bf16.msra.mxu1 %v1700_v37  ;;  %1575 = vmatprep.subr.bf16.mxu0 %v1701_v43  ;;  %v2050_v19 = vld [vmem:[%s1815_s27 + $0x24] sm:$0xff]   ;;  %v1687_v26 = vld [vmem:[%s1815_s27 + $0x30] sm:$0xff]   ;;  %v1691_v37 = vld [vmem:[%s1815_s27 + $0x38] ss:$0 sps:$4 sm:$0x11]  }
  0x36   : > { %748 = vrot.lane.b32.xlu1 %v730_v31, %s1747_s6  ;;  %v1991_v31 = vld [vmem:[%s1815_s27 + $0x24] sm:$0xff]   ;;  %v401_v36 = vor.u32 %v400_v29, %v396_v28  ;;  %v964_v45 = vrot.slane %v1938_v48, 1  ;;  %v951_v46 = vrot.slane %v1924_v40, 1  ;;  %v952_v47 = vrot.slane %v1945_v53, 1  ;;  %1596 = vmatprep.subr.bf16.mxu1 %v1701_v43 }
  0x37   : > { %740 = vrot.lane.b32.xlu0 %v718_v33, %s1747_s6  ;;  %v458_v33 = vshll.u32 %v1981_v22, 16  ;;  %v454_v49 = vsel %vm370_vm1, %v449_v35, %v453_v0  ;;  %v456_v50 = vshrl.u32 %v1981_v22, 16  ;;  %v463_v52 = vshll.u32 %v1994_v32, 16 }
  0x38   : > { %1576 = vmatpush3.bf16.msra.mxu0 %v1701_v43  ;;  %v965_v53 = vsel %vm483_vm0, %v963_v44, %v964_v45  ;;  %v953_v58 = vsel %vm483_vm0, %v951_v46, %v952_v47  ;;  %v502_v63 = vrot.slane %v1948_v54, 1  ;;  %v503_v3 = vrot.slane %v1962_v7, 1 }
  0x39   : > { %v460_v51 = vrot.slane %v458_v33, 1  ;;  %v465_v57 = vrot.slane %v463_v52, 1  ;;  %1599 = vmatpush3.bf16.msra.mxu1 %v1701_v43  ;;  %v491_v10 = vrot.slane %v1972_v17, 1  ;;  %v506_v7 = vrot.slane %v1994_v32, 1  ;;  %1601 = vmatprep.subr.msk.bf16.mxu0 %vm1161_vm2, %v1702_v12 }
  0x3a   : > { %750 = vrot.lane.b32.xlu1 %v733_v41, %s1747_s6  ;;  %v504_v13 = vsel %vm483_vm0, %v502_v63, %v503_v3  ;;  %1602 = vmatprep.subr.msk.bf16.mxu1 %vm1161_vm2, %v1702_v12  ;;  %v1163_v20 = vsel %vm1161_vm2, %v1702_v12, 0  ;;  %v679_v24 = vshll.u32 %v2044_v15, 16  ;;  %v631_v28 = vshll.u32 %v2050_v19, 16  ;;  %v1690_v33 = vld [vmem:[%s1815_s27 + $0x68] ss:$0 sps:$4 sm:$0x11]  }
  0x3b   : > { %742 = vrot.lane.b32.xlu0 %v721_v42, %s1747_s6  ;;  %v410_v42 = vshll.u32 %v1991_v31, 16  ;;  %v461_v56 = vor.u32 %v460_v51, %v456_v50  ;;  %v677_v29 = vshrl.u32 %v2044_v15, 16  ;;  %v696_v45 = vshll.u32 %v1690_v33, 16 }
  0x3c   : > { %1578 = vmatpush3.bf16.msra.mxu0 %v1163_v20  ;;  %v681_v32 = vrot.slane %v679_v24, 1  ;;  %v633_v35 = vrot.slane %v631_v28, 1  ;;  %v648_v50 = vshll.u32 %v1691_v37, 16  ;;  %v737_v63 = vrot.slane %v1686_v5, 1 }
  0x3d   : > { %v412_v48 = vrot.slane %v410_v42, 1  ;;  %v466_v62 = vsel %vm370_vm1, %v461_v56, %v465_v57  ;;  %1600 = vmatpush3.bf16.msra.mxu1 %v1163_v20  ;;  %v734_v56 = vrot.slane %v2044_v15, 1  ;;  %v738_v3 = vrot.slane %v1690_v33, 1 }
  0x3e   : > { %804 = vrot.lane.b32.xlu1 %v1904_v30, %s1748_s7  ;;  %v403_v30 = vshll.u32 %v1972_v17, 16  ;;  %v493_v17 = vrot.slane %v1991_v31, 1  ;;  %v682_v42 = vor.u32 %v681_v32, %v677_v29  ;;  %v726_v12 = vrot.slane %v1691_v37, 1  ;;  %v1699_v29 = vld [vmem:[%s1815_s27 + $0x44] ss:$0 sps:$4 sm:$0x11]  }
  0x3f   : > { %796 = vrot.lane.b32.xlu0 %v1913_v1, %s1748_s7  ;;  %v2001_v1 = vld [vmem:[%s1815_s27 + $0x2c] ss:$0 sps:$4 sm:$0x11]  }
  0x40   : > { %v405_v41 = vrot.slane %v403_v30, 1  ;;  %v494_v18 = vrot.slane %v2001_v1, 1  ;;  %v629_v30 = vshrl.u32 %v2050_v19, 16 }
  0x42   : > { %806 = vrot.lane.b32.xlu1 %v1919_v38, %s1748_s7  ;;  %v406_v55 = vsel %vm370_vm1, %v401_v36, %v405_v41  ;;  %v408_v38 = vshrl.u32 %v1991_v31, 16  ;;  %v495_v25 = vsel %vm483_vm0, %v493_v17, %v494_v18  ;;  %v689_v36 = vshrl.u32 %v1686_v5, 16  ;;  %v1695_v18 = vld [vmem:[%s1815_s27 + $0x3c] sm:$0xff]  }
  0x43   : > { %798 = vrot.lane.b32.xlu0 %v1924_v40, %s1748_s7  ;;  %v415_v40 = vshll.u32 %v2001_v1, 16  ;;  %v641_v41 = vshrl.u32 %v1687_v26, 16  ;;  %v634_v46 = vor.u32 %v633_v35, %v629_v30  ;;  %v875_v30 = vshll.u32 %v1695_v18, 16 }
  0x44   : > { %v413_v60 = vor.u32 %v412_v48, %v408_v38 }
  0x45   : > { %v417_v61 = vrot.slane %v415_v40, 1  ;;  %v650_v40 = vrot.slane %v648_v50, 1 }
  0x46   : > { %940 = vrot.lane.b32.xlu1 %v895_v8, %s1749_s8  ;;  %v490_v8 = vrot.slane %v1955_v59, 1 }
  0x47   : > { %932 = vrot.lane.b32.xlu0 %v847_v14, %s1749_s8  ;;  %v418_v6 = vsel %vm370_vm1, %v413_v60, %v417_v61  ;;  %v505_v14 = vrot.slane %v1981_v22, 1  ;;  %v722_v60 = vrot.slane %v2050_v19, 1 }
  0x48   : > { %v492_v16 = vsel %vm483_vm0, %v490_v8, %v491_v10  ;;  %v725_v10 = vrot.slane %v1687_v26, 1 }
  0x49   : > { %v507_v21 = vsel %vm483_vm0, %v505_v14, %v506_v7  ;;  %v739_v14 = vsel %vm483_vm0, %v737_v63, %v738_v3  ;;  %v2092_v7 = vld [vmem:[%s1815_s27 + $0x6c] sm:$0xff]  }
  0x4a   : > { %942 = vrot.lane.b32.xlu1 %v907_v23, %s1749_s8  ;;  %v1688_v23 = vld [vmem:[%s1815_s27 + $0x5c] ss:$0 sps:$4 sm:$0x11]   ;;  %v727_v17 = vsel %vm483_vm0, %v725_v10, %v726_v12  ;;  %v921_v32 = vshrl.u32 %v2092_v7, 16 }
  0x4b   : > { %934 = vrot.lane.b32.xlu0 %v859_v27, %s1749_s8  ;;  %v1689_v27 = vld [vmem:[%s1815_s27 + $0x2c] ss:$0 sps:$4 sm:$0x11]   ;;  %v684_v0 = vshll.u32 %v1688_v23, 16  ;;  %v735_v57 = vrot.slane %v1688_v23, 1 }
  0x4c   : > { %v636_v1 = vshll.u32 %v1689_v27, 16  ;;  %v723_v61 = vrot.slane %v1689_v27, 1 }
  0x4d   : > { %v686_v43 = vrot.slane %v684_v0, 1  ;;  %v873_v0 = vshrl.u32 %v1695_v18, 16 }
  0x4e   : > { %980 = vrot.lane.b32.xlu1 %v962_v34, %s1750_s13  ;;  %v691_v34 = vshll.u32 %v1686_v5, 16  ;;  %v638_v47 = vrot.slane %v636_v1, 1  ;;  %v724_v8 = vsel %vm483_vm0, %v722_v60, %v723_v61  ;;  %v957_v61 = vrot.slane %v1695_v18, 1 }
  0x4f   : > { %972 = vrot.lane.b32.xlu0 %v950_v39, %s1750_s13  ;;  %v643_v39 = vshll.u32 %v1687_v26, 16  ;;  %v687_v51 = vsel %vm370_vm1, %v682_v42, %v686_v43 }
  0x50   : > { %v693_v44 = vrot.slane %v691_v34, 1  ;;  %v639_v38 = vsel %vm370_vm1, %v634_v46, %v638_v47 }
  0x52   : > { %479 = vrot.lane.b32.xlu1 %v454_v49, %s1745_s30  ;;  %v645_v49 = vrot.slane %v643_v39, 1  ;;  %v694_v52 = vor.u32 %v693_v44, %v689_v36  ;;  %v877_v36 = vrot.slane %v875_v30, 1 }
  0x53   : > { %471 = vrot.lane.b32.xlu0 %v406_v55, %s1745_s30  ;;  %v698_v55 = vrot.slane %v696_v45, 1 }
  0x54   : > { %v646_v48 = vor.u32 %v645_v49, %v641_v41  ;;  %v880_v41 = vshll.u32 %v1699_v29, 16  ;;  %v878_v46 = vor.u32 %v877_v36, %v873_v0 }
  0x56   : > { %982 = vrot.lane.b32.xlu1 %v965_v53, %s1750_s13  ;;  %v699_v53 = vsel %vm370_vm1, %v694_v52, %v698_v55  ;;  %v882_v47 = vrot.slane %v880_v41, 1 }
  0x57   : > { %974 = vrot.lane.b32.xlu0 %v953_v58, %s1750_s13  ;;  %v651_v58 = vsel %vm370_vm1, %v646_v48, %v650_v40 }
  0x5a   : > { %481 = vrot.lane.b32.xlu1 %v466_v62, %s1745_s30  ;;  %v736_v62 = vsel %vm483_vm0, %v734_v56, %v735_v57  ;;  %v969_v57 = vrot.slane %v2092_v7, 1 }
  0x5b   : > { %473 = vrot.lane.b32.xlu0 %v418_v6, %s1745_s30  ;;  %v1692_v6 = vld [vmem:[%s1815_s27 + $0x60] sm:$0xff]   ;;  %s1442_s30 = sshll.u32 %s217_s25, 3 }
  0x5c   : > { %v966_v52 = vrot.slane %v1692_v6, 1 }
  0x5e   : > { %520 = vrot.lane.b32.xlu1 %v504_v13, %s1744_s29  ;;  %v1693_v13 = vld [vmem:[%s1815_s27 + $0x30] sm:$0xff]  }
  0x5f   : > { %512 = vrot.lane.b32.xlu0 %v492_v16, %s1744_s29  ;;  %v911_v16 = vshll.u32 %v1692_v6, 16  ;;  %v863_v20 = vshll.u32 %v1693_v13, 16  ;;  %v954_v48 = vrot.slane %v1693_v13, 1 }
  0x61   : > { %v913_v23 = vrot.slane %v911_v16, 1  ;;  %v865_v27 = vrot.slane %v863_v20, 1 }
  0x62   : > { %522 = vrot.lane.b32.xlu1 %v507_v21, %s1744_s29  ;;  %v909_v21 = vshrl.u32 %v1692_v6, 16 }
  0x63   : > { %514 = vrot.lane.b32.xlu0 %v495_v25, %s1744_s29  ;;  %v1698_v25 = vld [vmem:[%s1815_s27 + $0x74] ss:$0 sps:$4 sm:$0x11]  }
  0x64   : > { %v914_v33 = vor.u32 %v913_v23, %v909_v21  ;;  %v928_v1 = vshll.u32 %v1698_v25, 16 }
  0x66   : > { %576 = vrot.lane.b32.xlu1 %v2044_v15, %s1743_s28  ;;  %v1696_v15 = vld [vmem:[%s1815_s27 + $0x68] ss:$0 sps:$4 sm:$0x11]   ;;  %v930_v44 = vrot.slane %v928_v1, 1 }
  0x67   : > { %568 = vrot.lane.b32.xlu0 %v2050_v19, %s1743_s28  ;;  %v1697_v19 = vld [vmem:[%s1815_s27 + $0x38] ss:$0 sps:$4 sm:$0x11]   ;;  %v916_v24 = vshll.u32 %v1696_v15, 16  ;;  %v967_v55 = vrot.slane %v1696_v15, 1 }
  0x68   : > { %v868_v28 = vshll.u32 %v1697_v19, 16  ;;  %v955_v40 = vrot.slane %v1697_v19, 1 }
  0x69   : > { %v918_v34 = vrot.slane %v916_v24, 1  ;;  %v968_v56 = vsel %vm483_vm0, %v966_v52, %v967_v55 }
  0x6a   : > { %578 = vrot.lane.b32.xlu1 %v1686_v5, %s1743_s28  ;;  %v861_v5 = vshrl.u32 %v1693_v13, 16  ;;  %v870_v39 = vrot.slane %v868_v28, 1  ;;  %v956_v60 = vsel %vm483_vm0, %v954_v48, %v955_v40 }
  0x6b   : > { %570 = vrot.lane.b32.xlu0 %v1687_v26, %s1743_s28  ;;  %v923_v26 = vshll.u32 %v2092_v7, 16  ;;  %v919_v42 = vsel %vm370_vm1, %v914_v33, %v918_v34 }
  0x6c   : > { %v866_v37 = vor.u32 %v865_v27, %v861_v5 }
  0x6d   : > { %v925_v35 = vrot.slane %v923_v26, 1 }
  0x6e   : > { %712 = vrot.lane.b32.xlu1 %v687_v51, %s1746_s5  ;;  %v871_v45 = vsel %vm370_vm1, %v866_v37, %v870_v39 }
  0x6f   : > { %704 = vrot.lane.b32.xlu0 %v639_v38, %s1746_s5  ;;  %v926_v43 = vor.u32 %v925_v35, %v921_v32  ;;  %v883_v38 = vsel %vm370_vm1, %v878_v46, %v882_v47 }
  0x71   : > { %v931_v51 = vsel %vm370_vm1, %v926_v43, %v930_v44 }
  0x72   : > { %714 = vrot.lane.b32.xlu1 %v699_v53, %s1746_s5 }
  0x73   : > { %706 = vrot.lane.b32.xlu0 %v651_v58, %s1746_s5  ;;  %v970_v58 = vrot.slane %v1698_v25, 1  ;;  %s2227_s5 = scalar_lea.vmem %s2290_s4, %s1442_s30 }
  0x76   : > { %752 = vrot.lane.b32.xlu1 %v736_v62, %s1747_s6  ;;  %v958_v62 = vrot.slane %v1699_v29, 1 }
  0x77   : > { %744 = vrot.lane.b32.xlu0 %v724_v8, %s1747_s6 }
  0x78   : > { %v959_v8 = vsel %vm483_vm0, %v957_v61, %v958_v62 }
  0x7a   : > { %754 = vrot.lane.b32.xlu1 %v739_v14, %s1747_s6 }
  0x7b   : > { %746 = vrot.lane.b32.xlu0 %v727_v17, %s1747_s6 }
  0x7e   : > { %808 = vrot.lane.b32.xlu1 %v1692_v6, %s1748_s7  ;;  %v971_v6 = vsel %vm483_vm0, %v969_v57, %v970_v58 }
  0x7f   : > { %800 = vrot.lane.b32.xlu0 %v1693_v13, %s1748_s7 }
  0x82   : > { %810 = vrot.lane.b32.xlu1 %v2092_v7, %s1748_s7 }
  0x83   : > { %802 = vrot.lane.b32.xlu0 %v1695_v18, %s1748_s7 }
  0x86   : > { %944 = vrot.lane.b32.xlu1 %v919_v42, %s1749_s8 }
  0x87   : > { %936 = vrot.lane.b32.xlu0 %v871_v45, %s1749_s8 }
  0x88   : > { %v573_v49 = vpop.permute.xlu1 %572  ;;  %v565_v50 = vpop.permute.xlu0 %564 }
  0x8a   : > { %946 = vrot.lane.b32.xlu1 %v931_v51, %s1749_s8 }
  0x8b   : > { %938 = vrot.lane.b32.xlu0 %v883_v38, %s1749_s8 }
  0x8c   : > { %v517_v53 = vpop.permute.xlu1 %516 }
  0x8d   : > { %v509_v63 = vpop.permute.xlu0 %508 }
  0x8e   : > { %984 = vrot.lane.b32.xlu1 %v968_v56, %s1750_s13 }
  0x8f   : > { %976 = vrot.lane.b32.xlu0 %v956_v60, %s1750_s13 }
  0x90   : > { %v519_v3 = vpop.permute.xlu1 %518 }
  0x91   : > { %v511_v10 = vpop.permute.xlu0 %510 }
  0x92   : > { %986 = vrot.lane.b32.xlu1 %v971_v6, %s1750_s13 }
  0x93   : > { %978 = vrot.lane.b32.xlu0 %v959_v8, %s1750_s13 }
  0x94   : > { %v470_v12 = vpop.permute.xlu1 %469 }
  0x95   : > { %v468_v13 = vpop.permute.xlu0 %467  ;;  %v992_v47 = vsel %vm988_vm3, %v1842_v11, %v470_v12 }
  0x96   : > { %v990_v30 = vsel %vm988_vm3, %v1832_v4, %v468_v13  ;;  %v1009_v38 = vsel %vm1005_vm4, %v992_v47, %v511_v10 }
  0x97   : > { %v1007_v34 = vsel %vm1005_vm4, %v990_v30, %v509_v63 }
  0x98   : > { %v478_v14 = vpop.permute.xlu1 %477 }
  0x99   : > { %v476_v7 = vpop.permute.xlu0 %475  ;;  %v1000_v43 = vsel %vm988_vm3, %v1838_v9, %v478_v14 }
  0x9a   : > { %v998_v29 = vsel %vm988_vm3, %v1828_v2, %v476_v7  ;;  %v1024_v2 = vsel %vm1022_vm5, %v1007_v34, %v565_v50  ;;  %v1017_v55 = vsel %vm1005_vm4, %v1000_v43, %v519_v3 }
  0x9b   : > { %v1015_v0 = vsel %vm1005_vm4, %v998_v29, %v517_v53 }
  0x9c   : > { %v575_v15 = vpop.permute.xlu1 %574  ;;  %v1032_v35 = vsel %vm1022_vm5, %v1015_v0, %v573_v49 }
  0x9d   : > { %v567_v16 = vpop.permute.xlu0 %566  ;;  %v1034_v9 = vsel %vm1022_vm5, %v1017_v55, %v575_v15 }
  0x9e   : > { %v1026_v11 = vsel %vm1022_vm5, %v1009_v38, %v567_v16 }
  0xa0   : > { %v709_v17 = vpop.permute.xlu1 %708 }
  0xa1   : > { %v701_v18 = vpop.permute.xlu0 %700  ;;  %v1049_v37 = vsel %vm1039_vm6, %v1032_v35, %v709_v17 }
  0xa2   : > { %v1041_v4 = vsel %vm1039_vm6, %v1024_v2, %v701_v18 }
  0xa4   : > { %v711_v19 = vpop.permute.xlu1 %710 }
  0xa5   : > { %v703_v20 = vpop.permute.xlu0 %702  ;;  %v1051_v40 = vsel %vm1039_vm6, %v1034_v9, %v711_v19 }
  0xa6   : > { %v1043_v56 = vsel %vm1039_vm6, %v1026_v11, %v703_v20 }
  0xa8   : > { %v749_v21 = vpop.permute.xlu1 %748 }
  0xa9   : > { %v741_v5 = vpop.permute.xlu0 %740  ;;  %v1066_v36 = vsel %vm1056_vm7, %v1049_v37, %v749_v21 }
  0xaa   : > { %v1058_v41 = vsel %vm1056_vm7, %v1041_v4, %v741_v5 }
  0xac   : > { %v751_v23 = vpop.permute.xlu1 %750 }
  0xad   : > { %v743_v24 = vpop.permute.xlu0 %742  ;;  %v1068_v57 = vsel %vm1056_vm7, %v1051_v40, %v751_v23 }
  0xae   : > { %v1060_v58 = vsel %vm1056_vm7, %v1043_v56, %v743_v24 }
  0xb0   : > { %v805_v25 = vpop.permute.xlu1 %804 }
  0xb1   : > { %v797_v26 = vpop.permute.xlu0 %796  ;;  %v1083_v42 = vsel %vm1073_vm8, %v1066_v36, %v805_v25 }
  0xb2   : > { %v1075_v44 = vsel %vm1073_vm8, %v1058_v41, %v797_v26 }
  0xb4   : > { %v807_v27 = vpop.permute.xlu1 %806 }
  0xb5   : > { %v799_v28 = vpop.permute.xlu0 %798  ;;  %v1085_v60 = vsel %vm1073_vm8, %v1068_v57, %v807_v27 }
  0xb6   : > { %v1077_v61 = vsel %vm1073_vm8, %v1060_v58, %v799_v28 }
  0xb8   : > { %v941_v32 = vpop.permute.xlu1 %940 }
  0xb9   : > { %v933_v33 = vpop.permute.xlu0 %932  ;;  %v1100_v45 = vsel %vm1090_vm9, %v1083_v42, %v941_v32 }
  0xba   : > { %v1092_v49 = vsel %vm1090_vm9, %v1075_v44, %v933_v33 }
  0xbc   : > { %v943_v1 = vpop.permute.xlu1 %942 }
  0xbd   : > { %v935_v39 = vpop.permute.xlu0 %934  ;;  %v1102_v62 = vsel %vm1090_vm9, %v1085_v60, %v943_v1 }
  0xbe   : > { %v1094_v3 = vsel %vm1090_vm9, %v1077_v61, %v935_v39 }
  0xc0   : > { %v981_v46 = vpop.permute.xlu1 %980 }
  0xc1   : > { %v973_v50 = vpop.permute.xlu0 %972  ;;  %v1117_v51 = vsel %vm1107_vm10, %v1100_v45, %v981_v46 }
  0xc2   : > { %v1109_v52 = vsel %vm1107_vm10, %v1092_v49, %v973_v50  ;;  %1587 = vmatprep.mubr.msk.bf16.mxu1 %vm1144_vm11, %v1117_v51 }
  0xc3   : > { %1579 = vmatprep.mubr.msk.bf16.mxu0 %vm1144_vm11, %v1109_v52 }
  0xc4   : > { %v480_v48 = vpop.permute.xlu1 %479 }
  0xc5   : > { %v472_v53 = vpop.permute.xlu0 %471  ;;  %v1002_v14 = vsel %vm988_vm3, %v1948_v54, %v480_v48 }
  0xc6   : > { %v994_v15 = vsel %vm988_vm3, %v1955_v59, %v472_v53 }
  0xc8   : > { %v983_v63 = vpop.permute.xlu1 %982 }
  0xc9   : > { %v1119_v6 = vsel %vm1107_vm10, %v1102_v62, %v983_v63  ;;  %v975_v8 = vpop.permute.xlu0 %974 }
  0xca   : > { %v1111_v10 = vsel %vm1107_vm10, %v1094_v3, %v975_v8  ;;  %1588 = vmatmul.mubr.msk.bf16.vlgmr.msra.gmra.mrb[0].mxu1 %vm1144_vm11, %v1119_v6  ;;  %v2211_v8 = vld [vmem:[%s2288_s2] ss:$0 sm:$0xff] }
  0xcb   : > { %1580 = vmatmul.mubr.msk.bf16.vlgmr.msra.gmra.mrb[0].mxu0 %vm1144_vm11, %v1111_v10  ;;  %v2216_v10 = vld [vmem:[%s2289_s3] ss:$0 sm:$0xff] }
  0xcc   : > { %v482_v12 = vpop.permute.xlu1 %481 }
  0xcd   : > { %v474_v13 = vpop.permute.xlu0 %473  ;;  %v1004_v19 = vsel %vm988_vm3, %v1981_v22, %v482_v12 }
  0xce   : > { %v996_v21 = vsel %vm988_vm3, %v1991_v31, %v474_v13 }
  0xd0   : > { %v521_v7 = vpop.permute.xlu1 %520 }
  0xd1   : > { %v1019_v16 = vsel %vm1005_vm4, %v1002_v14, %v521_v7  ;;  %v513_v17 = vpop.permute.xlu0 %512 }
  0xd2   : > { %v1011_v18 = vsel %vm1005_vm4, %v994_v15, %v513_v17 }
  0xd4   : > { %v523_v20 = vpop.permute.xlu1 %522 }
  0xd5   : > { %v1021_v5 = vsel %vm1005_vm4, %v1004_v19, %v523_v20  ;;  %v515_v23 = vpop.permute.xlu0 %514 }
  0xd6   : > { %v1013_v54 = vsel %vm1005_vm4, %v996_v21, %v515_v23 }
  0xd8   : > { %v577_v24 = vpop.permute.xlu1 %576 }
  0xd9   : > { %v569_v25 = vpop.permute.xlu0 %568  ;;  %v1036_v39 = vsel %vm1022_vm5, %v1019_v16, %v577_v24 }
  0xda   : > { %v1028_v36 = vsel %vm1022_vm5, %v1011_v18, %v569_v25 }
  0xdc   : > { %v579_v59 = vpop.permute.xlu1 %578 }
  0xdd   : > { %v571_v26 = vpop.permute.xlu0 %570  ;;  %v1038_v47 = vsel %vm1022_vm5, %v1021_v5, %v579_v59 }
  0xde   : > { %v1030_v52 = vsel %vm1022_vm5, %v1013_v54, %v571_v26 }
  0xe0   : > { %v713_v27 = vpop.permute.xlu1 %712 }
  0xe1   : > { %v705_v28 = vpop.permute.xlu0 %704  ;;  %v1053_v41 = vsel %vm1039_vm6, %v1036_v39, %v713_v27 }
  0xe2   : > { %v1045_v43 = vsel %vm1039_vm6, %v1028_v36, %v705_v28 }
  0xe4   : > { %v715_v29 = vpop.permute.xlu1 %714 }
  0xe5   : > { %v707_v30 = vpop.permute.xlu0 %706  ;;  %v1055_v55 = vsel %vm1039_vm6, %v1038_v47, %v715_v29 }
  0xe6   : > { %v1047_v11 = vsel %vm1039_vm6, %v1030_v52, %v707_v30 }
  0xe8   : > { %v753_v32 = vpop.permute.xlu1 %752 }
  0xe9   : > { %v745_v0 = vpop.permute.xlu0 %744  ;;  %v1070_v44 = vsel %vm1056_vm7, %v1053_v41, %v753_v32 }
  0xea   : > { %v1062_v45 = vsel %vm1056_vm7, %v1045_v43, %v745_v0 }
  0xec   : > { %v755_v22 = vpop.permute.xlu1 %754 }
  0xed   : > { %v747_v33 = vpop.permute.xlu0 %746  ;;  %v1072_v40 = vsel %vm1056_vm7, %v1055_v55, %v755_v22 }
  0xee   : > { %v1064_v56 = vsel %vm1056_vm7, %v1047_v11, %v747_v33 }
  0xf0   : > { %v809_v34 = vpop.permute.xlu1 %808 }
  0xf1   : > { %v801_v35 = vpop.permute.xlu0 %800  ;;  %v1087_v46 = vsel %vm1073_vm8, %v1070_v44, %v809_v34 }
  0xf2   : > { %v1079_v49 = vsel %vm1073_vm8, %v1062_v45, %v801_v35 }
  0xf4   : > { %v811_v31 = vpop.permute.xlu1 %810 }
  0xf5   : > { %v803_v1 = vpop.permute.xlu0 %802  ;;  %v1089_v57 = vsel %vm1073_vm8, %v1072_v40, %v811_v31 }
  0xf6   : > { %v1081_v58 = vsel %vm1073_vm8, %v1064_v56, %v803_v1 }
  0xf8   : > { %v945_v37 = vpop.permute.xlu1 %944 }
  0xf9   : > { %v937_v2 = vpop.permute.xlu0 %936  ;;  %v1104_v50 = vsel %vm1090_vm9, %v1087_v46, %v945_v37 }
  0xfa   : > { %v1096_v9 = vsel %vm1090_vm9, %v1079_v49, %v937_v2 }
  0xfc   : > { %v947_v4 = vpop.permute.xlu1 %946 }
  0xfd   : > { %v939_v42 = vpop.permute.xlu0 %938  ;;  %v1106_v60 = vsel %vm1090_vm9, %v1089_v57, %v947_v4 }
  0xfe   : > { %v1098_v62 = vsel %vm1090_vm9, %v1081_v58, %v939_v42 }
 0x100   : > { %v985_v51 = vpop.permute.xlu1 %984 }
 0x101   : > { %v1121_v38 = vsel %vm1107_vm10, %v1104_v50, %v985_v51  ;;  %v977_v48 = vpop.permute.xlu0 %976 }
 0x102   : > { %v1113_v53 = vsel %vm1107_vm10, %v1096_v9, %v977_v48  ;;  %1591 = vmatprep.mubr.msk.bf16.mxu1 %vm1144_vm11, %v1121_v38 }
 0x103   : > { %1583 = vmatprep.mubr.msk.bf16.mxu0 %vm1144_vm11, %v1113_v53 }
 0x104   : > { %v987_v61 = vpop.permute.xlu1 %986 }
 0x105   : > { %v1123_v63 = vsel %vm1107_vm10, %v1106_v60, %v987_v61  ;;  %v979_v3 = vpop.permute.xlu0 %978 }
 0x106   : > { %v1115_v6 = vsel %vm1107_vm10, %v1098_v62, %v979_v3  ;;  %1592 = vmatmul.mubr.msk.bf16.gmra.mrb[4].mxu1 %vm1144_vm11, %v1123_v63 }
 0x107   : > { %1584 = vmatmul.mubr.msk.bf16.gmra.mrb[4].mxu0 %vm1144_vm11, %v1115_v6 }
 0x19d   : > { %v1589_v12 = vpop.f32.mrb[0].mxu1 }
 0x19e   : > { %v1581_v13 = vpop.f32.mrb[0].mxu0  ;;  %v1279_v14 = vmul.f32 %v1589_v12, %v2211_v8  ;;  %v1231_v7 = vpop.f32.mrb[1].mxu1 }
 0x19f   : > { %v1271_v15 = vmul.f32 %v1581_v13, %v2211_v8  ;;  %v1199_v16 = vpop.f32.mrb[1].mxu0  ;;  %v1277_v17 = vmul.f32 %v2211_v8, %v1231_v7  ;;  %v1590_v18 = vpop.f32.mrb[2].mxu1 }
 0x1a0   : > { %v1302_v19 = vadd.f32 %v2216_v10, %v1279_v14  ;;  %v1269_v20 = vmul.f32 %v2211_v8, %v1199_v16  ;;  %v1582_v21 = vpop.f32.mrb[2].mxu0  ;;  %v1280_v5 = vmul.f32 %v1590_v18, %v2211_v8  ;;  %v1234_v23 = vpop.f32.mrb[3].mxu1 }
 0x1a1   : > { %v1294_v54 = vadd.f32 %v2216_v10, %v1271_v15  ;;  %v1300_v24 = vadd.f32 %v2216_v10, %v1277_v17  ;;  %v1272_v25 = vmul.f32 %v1582_v21, %v2211_v8  ;;  %v1202_v59 = vpop.f32.mrb[3].mxu0  ;;  %v1278_v26 = vmul.f32 %v2211_v8, %v1234_v23 }
 0x1a2   : > { %v1318_v27 = vmax.f32 %v1302_v19, 0.0  ;;  %v1292_v28 = vadd.f32 %v2216_v10, %v1269_v20  ;;  %v1303_v29 = vadd.f32 %v2216_v10, %v1280_v5  ;;  %v1270_v30 = vmul.f32 %v2211_v8, %v1202_v59 }
 0x1a3   : > { %v1310_v32 = vmax.f32 %v1294_v54, 0.0  ;;  %v1316_v0 = vmax.f32 %v1300_v24, 0.0  ;;  %v1295_v22 = vadd.f32 %v2216_v10, %v1272_v25  ;;  %v1301_v33 = vadd.f32 %v2216_v10, %v1278_v26 }
 0x1a4   : > { %1334 = vst [vmem:[%s2227_s5 + $0x50] sm:$0xff] %v1318_v27  ;;  %v1308_v34 = vmax.f32 %v1292_v28, 0.0  ;;  %v1319_v35 = vmax.f32 %v1303_v29, 0.0  ;;  %v1293_v31 = vadd.f32 %v2216_v10, %v1270_v30 }
 0x1a5   : > { %1326 = vst [vmem:[%s2227_s5 + $0x10] sm:$0xff] %v1310_v32  ;;  %1332 = vst [vmem:[%s2227_s5 + $0x40] sm:$0xff] %v1316_v0  ;;  %v1311_v1 = vmax.f32 %v1295_v22, 0.0  ;;  %v1317_v37 = vmax.f32 %v1301_v33, 0.0 }
 0x1a6   : > { %1324 = vst [vmem:[%s2227_s5] sm:$0xff] %v1308_v34  ;;  %1335 = vst [vmem:[%s2227_s5 + $0x58] sm:$0xff] %v1319_v35  ;;  %v1309_v2 = vmax.f32 %v1293_v31, 0.0 }
 0x1a7   : > { %1327 = vst [vmem:[%s2227_s5 + $0x18] sm:$0xff] %v1311_v1  ;;  %1333 = vst [vmem:[%s2227_s5 + $0x48] sm:$0xff] %v1317_v37 }
 0x1a8   : > { %1325 = vst [vmem:[%s2227_s5 + $0x8] sm:$0xff] %v1309_v2 }
 0x1d9   : > { %v1593_v39 = vpop.f32.mrb[4].mxu1 }
 0x1da   : > { %v1585_v4 = vpop.f32.mrb[4].mxu0  ;;  %v1283_v36 = vmul.f32 %v1593_v39, %v2211_v8  ;;  %v1247_v41 = vpop.f32.mrb[5].mxu1 }
 0x1db   : > { %v1275_v42 = vmul.f32 %v1585_v4, %v2211_v8  ;;  %v1215_v43 = vpop.f32.mrb[5].mxu0  ;;  %v1281_v44 = vmul.f32 %v2211_v8, %v1247_v41  ;;  %v1594_v45 = vpop.f32.mrb[6].mxu1 }
 0x1dc   : > { %v1306_v46 = vadd.f32 %v2216_v10, %v1283_v36  ;;  %v1273_v47 = vmul.f32 %v2211_v8, %v1215_v43  ;;  %v1586_v49 = vpop.f32.mrb[6].mxu0  ;;  %v1284_v50 = vmul.f32 %v1594_v45, %v2211_v8  ;;  %v1250_v51 = vpop.f32.mrb[7].mxu1 }
 0x1dd   : > { %v1298_v52 = vadd.f32 %v2216_v10, %v1275_v42  ;;  %v1304_v55 = vadd.f32 %v2216_v10, %v1281_v44  ;;  %v1276_v9 = vmul.f32 %v1586_v49, %v2211_v8  ;;  %v1218_v38 = vpop.f32.mrb[7].mxu0  ;;  %v1282_v48 = vmul.f32 %v2211_v8, %v1250_v51 }
 0x1de   : > { %v1322_v11 = vmax.f32 %v1306_v46, 0.0  ;;  %v1296_v40 = vadd.f32 %v2216_v10, %v1273_v47  ;;  %v1307_v53 = vadd.f32 %v2216_v10, %v1284_v50  ;;  %v1274_v56 = vmul.f32 %v2211_v8, %v1218_v38 }
 0x1df   : > { %v1314_v57 = vmax.f32 %v1298_v52, 0.0  ;;  %v1320_v58 = vmax.f32 %v1304_v55, 0.0  ;;  %v1299_v60 = vadd.f32 %v2216_v10, %v1276_v9  ;;  %v1305_v61 = vadd.f32 %v2216_v10, %v1282_v48 }
 0x1e0   : > { %1338 = vst [vmem:[%s2227_s5 + $0x70] sm:$0xff] %v1322_v11  ;;  %v1312_v62 = vmax.f32 %v1296_v40, 0.0  ;;  %v1323_v63 = vmax.f32 %v1307_v53, 0.0  ;;  %v1297_v3 = vadd.f32 %v2216_v10, %v1274_v56 }
 0x1e1   : > { %1330 = vst [vmem:[%s2227_s5 + $0x30] sm:$0xff] %v1314_v57  ;;  %1336 = vst [vmem:[%s2227_s5 + $0x60] sm:$0xff] %v1320_v58  ;;  %v1315_v6 = vmax.f32 %v1299_v60, 0.0  ;;  %v1321_v12 = vmax.f32 %v1305_v61, 0.0 }
 0x1e2   : > { %1328 = vst [vmem:[%s2227_s5 + $0x20] sm:$0xff] %v1312_v62  ;;  %1339 = vst [vmem:[%s2227_s5 + $0x78] sm:$0xff] %v1323_v63  ;;  %v1313_v8 = vmax.f32 %v1297_v3, 0.0 }
 0x1e3   : > { %1331 = vst [vmem:[%s2227_s5 + $0x38] sm:$0xff] %v1315_v6  ;;  %1337 = vst [vmem:[%s2227_s5 + $0x68] sm:$0xff] %v1321_v12 }
 0x1e4   : > { %1329 = vst [vmem:[%s2227_s5 + $0x28] sm:$0xff] %v1313_v8 }
 0x1e5 PF: > { %s14_s19 = sadd.s32 1, %s1741_s19   ;;  %s2291_s15 = smov %s1733_s17 }
 0x1e6   : > { %p11_p7 = scmp.ge.s32.totalorder %s14_s19, 6   ;;  %s2292_s16 = smov %s1737_s18 }
 0x1e7   : > { %s2293_s17 = smov %s2296_s20  ;;  %s2294_s18 = smov %s2300_s21 }
 0x1e8   :  { %13 = sbr.rel (!%p11_p7) target bundleno = 3 (0x3), region = 69 }

</bundles_post_ra>
